<compile_context>
chip_gen: v7x
topology: tpu7x:2x2x1
jax: 0.10.0
libtpu: 0.0.40
codegen_flags: <defaults>
</compile_context>

<pallas_src>
import functools

import jax
import jax.numpy as jnp
import numpy as np
from jax import lax
from jax.experimental import pallas as pl
from jax.experimental.pallas import tpu as pltpu

# Set to jnp.bfloat16 on v6e/v7x for 2x MXU throughput (accumulation stays
# f32).  Default f32 keeps the numerical check against the f32 reference tight.
_MXU_DTYPE = jnp.float32

# Explicit scoped-VMEM limit (don't rely on per-generation defaults; safe on
# v5e/v6e/v7x -- v7x only has 64 MiB physical VMEM per TensorCore).
_VMEM_LIMIT = 32 * 1024 * 1024

_COMPILER_PARAMS = pltpu.CompilerParams(
    dimension_semantics=("parallel",),   # all grids are 1-D and independent
    vmem_limit_bytes=_VMEM_LIMIT,
)


# ----------------------------------------------------------------------------
# Tile pickers
# ----------------------------------------------------------------------------
def _pick_tile_rows(dim, target):
    """Largest divisor of `dim` <= target that is a multiple of 8 (sublane
    constraint on the second-to-last block dim); falls back to the full dim."""
    target = min(target, dim)
    for t in range(target, 0, -1):
        if dim % t == 0 and t % 8 == 0:
            return t
    return dim


def _pick_div(dim, target):
    """Largest divisor of `dim` <= target (leading block dims are
    unconstrained)."""
    target = min(target, dim)
    for t in range(target, 0, -1):
        if dim % t == 0:
            return t
    return dim


# ----------------------------------------------------------------------------
# Kernel 1: gridded GEMM + bias  (all 1x1 convolutions, fused across branches)
# ----------------------------------------------------------------------------
def _matmul_bias_kernel(x_ref, w_ref, b_ref, o_ref):
    # x: (TM, K), w: (K, Cout), b: (1, Cout), o: (TM, Cout)
    acc = jnp.dot(x_ref[...].astype(_MXU_DTYPE),
                  w_ref[...].astype(_MXU_DTYPE),
                  preferred_element_type=jnp.float32)
    o_ref[...] = (acc + b_ref[...]).astype(o_ref.dtype)


def _pallas_matmul_bias(x2d, w2d, bias, *, tile_m=256):
    """y = x2d @ w2d + bias, gridded & software-pipelined over the M rows."""
    M, K = x2d.shape
    Cout = w2d.shape[1]
    tm = _pick_tile_rows(M, tile_m)
    return pl.pallas_call(
        _matmul_bias_kernel,
        out_shape=jax.ShapeDtypeStruct((M, Cout), x2d.dtype),
        grid_spec=pltpu.PrefetchScalarGridSpec(
            num_scalar_prefetch=0,
            grid=(M // tm,),
            in_specs=[
                pl.BlockSpec((tm, K), lambda i: (i, 0)),     # streamed row tiles
                pl.BlockSpec((K, Cout), lambda i: (0, 0)),   # weight resident
                pl.BlockSpec((1, Cout), lambda i: (0, 0)),   # bias resident
            ],
            out_specs=pl.BlockSpec((tm, Cout), lambda i: (i, 0)),
        ),
        compiler_params=_COMPILER_PARAMS,
    )(x2d, w2d, bias.reshape(1, Cout))


# ----------------------------------------------------------------------------
# Kernel 2: 1-D separable conv ((1,n) / (n,1)), in-kernel padding + tap accum
# ----------------------------------------------------------------------------
def _sepconv1d_kernel(x_ref, w_ref, b_ref, o_ref, xpad_ref, *, n, pad):
    # x: (TR, L, Cin) -- conv along axis 1, zero padding `pad` each side
    # w: (n, Cin, Cout), b: (1, Cout), o: (TR, L, Cout)
    # xpad: VMEM scratch (L + n - 1, Cin); halo rows stay zero.
    TR, L, _ = x_ref.shape
    xpad_ref[...] = jnp.zeros_like(xpad_ref)

    def row_body(r, carry):
        # Zero-padding happens here in VMEM -- no jnp.pad / im2col in HBM.
        xpad_ref[pad:pad + L, :] = x_ref[r].astype(xpad_ref.dtype)
        acc = jnp.dot(xpad_ref[0:L, :], w_ref[0].astype(_MXU_DTYPE),
                      preferred_element_type=jnp.float32)
        for k in range(1, n):                       # static taps, f32 accumulate
            acc = acc + jnp.dot(xpad_ref[k:k + L, :],
                                w_ref[k].astype(_MXU_DTYPE),
                                preferred_element_type=jnp.float32)
        o_ref[r] = (acc + b_ref[...]).astype(o_ref.dtype)
        return carry

    lax.fori_loop(0, TR, row_body, 0)


def _pallas_sepconv1d(x3d, w, b, *, tile_r=16):
    R, L, Cin = x3d.shape
    n, _, Cout = w.shape
    pad = n // 2
    tr = _pick_div(R, tile_r)
    kernel = functools.partial(_sepconv1d_kernel, n=n, pad=pad)
    return pl.pallas_call(
        kernel,
        out_shape=jax.ShapeDtypeStruct((R, L, Cout), x3d.dtype),
        grid_spec=pltpu.PrefetchScalarGridSpec(
            num_scalar_prefetch=0,
            grid=(R // tr,),
            in_specs=[
                pl.BlockSpec((tr, L, Cin), lambda i: (i, 0, 0)),
                pl.BlockSpec((n, Cin, Cout), lambda i: (0, 0, 0)),  # resident
                pl.BlockSpec((1, Cout), lambda i: (0, 0)),          # resident
            ],
            out_specs=pl.BlockSpec((tr, L, Cout), lambda i: (i, 0, 0)),
            scratch_shapes=[pltpu.VMEM((L + n - 1, Cin), _MXU_DTYPE)],
        ),
        compiler_params=_COMPILER_PARAMS,
    )(x3d, w, b.reshape(1, Cout))


# ----------------------------------------------------------------------------
# Kernel 3: AvgPool 3x3 (stride 1, pad 1, count_include_pad) + bias, fused
# ----------------------------------------------------------------------------
def _avgpool3x3_bias_kernel(x_ref, b_ref, o_ref, xpad_ref):
    # x: (1, H, W, C), b: (1, C), o: (1, H, W, C); xpad: VMEM (H+2, W+2, C) f32
    _, H, W, _ = x_ref.shape
    xpad_ref[...] = jnp.zeros_like(xpad_ref)          # in-kernel zero padding
    xpad_ref[1:1 + H, 1:1 + W, :] = x_ref[0].astype(jnp.float32)
    # Accumulate along H first (outer dim -> cheap vreg re-indexing), then do
    # the W (sublane) shifts on the already-reduced array.
    rows = (xpad_ref[0:H, :, :] + xpad_ref[1:1 + H, :, :]
            + xpad_ref[2:2 + H, :, :])                # (H, W+2, C)
    acc = rows[:, 0:W, :] + rows[:, 1:1 + W, :] + rows[:, 2:2 + W, :]
    o_ref[0] = (acc * (1.0 / 9.0) + b_ref[...]).astype(o_ref.dtype)


def _pallas_avgpool3x3_bias(x_nhwc, bias):
    N, H, W, C = x_nhwc.shape
    return pl.pallas_call(
        _avgpool3x3_bias_kernel,
        out_shape=jax.ShapeDtypeStruct((N, H, W, C), x_nhwc.dtype),
        grid_spec=pltpu.PrefetchScalarGridSpec(
            num_scalar_prefetch=0,
            grid=(N,),
            in_specs=[
                pl.BlockSpec((1, H, W, C), lambda b: (b, 0, 0, 0)),
                pl.BlockSpec((1, C), lambda b: (0, 0)),
            ],
            out_specs=pl.BlockSpec((1, H, W, C), lambda b: (b, 0, 0, 0)),
            scratch_shapes=[pltpu.VMEM((H + 2, W + 2, C), jnp.float32)],
        ),
        compiler_params=_COMPILER_PARAMS,
    )(x_nhwc, bias.reshape(1, C))


# ----------------------------------------------------------------------------
# Conv wrappers (plain-JAX glue: reshapes / transposes only)
# ----------------------------------------------------------------------------
def conv1x1_fused(x, w_cat, b_cat):
    N, H, W, Cin = x.shape
    Cout = w_cat.shape[1]
    y = _pallas_matmul_bias(x.reshape(-1, Cin), w_cat, b_cat)
    return y.reshape(N, H, W, Cout)


def conv1xn(x, w, b):
    # (1, n) conv along W.  w: (n, Cin, Cout)
    n, Cin, Cout = w.shape
    N, H, W, _ = x.shape
    y = _pallas_sepconv1d(x.reshape(N * H, W, Cin), w, b)
    return y.reshape(N, H, W, Cout)


def convnx1(x, w, b):
    # (n, 1) conv along H: swap H<->W and reuse the 1-D kernel.
    n, Cin, Cout = w.shape
    N, H, W, _ = x.shape
    xt = jnp.transpose(x, (0, 2, 1, 3)).reshape(N * W, H, Cin)
    y = _pallas_sepconv1d(xt, w, b).reshape(N, W, H, Cout)
    return jnp.transpose(y, (0, 2, 1, 3))


# ----------------------------------------------------------------------------
# Parameters (deterministic synthetic init; shapes follow the nn.Module)
# ----------------------------------------------------------------------------
def init_params(key, in_fts, out_fts, n=7):
    def conv(key, cin, cout, kh, kw):
        kw_, kb_ = jax.random.split(key)
        fan_in = cin * kh * kw
        scale = 1.0 / np.sqrt(fan_in)
        if (kh, kw) == (1, 1):
            w = jax.random.uniform(kw_, (cin, cout), jnp.float32, -scale, scale)
        elif kh == 1:                  # (1, n): taps along W -> (n, Cin, Cout)
            w = jax.random.uniform(kw_, (kw, cin, cout), jnp.float32, -scale, scale)
        else:                          # (n, 1): taps along H -> (n, Cin, Cout)
            w = jax.random.uniform(kw_, (kh, cin, cout), jnp.float32, -scale, scale)
        b = jax.random.uniform(kb_, (cout,), jnp.float32, -scale, scale)
        return w, b

    ks = jax.random.split(key, 11)
    f0, f1, f2, f3 = out_fts
    params = {
        "b1": [conv(ks[0], in_fts, f0, 1, 1),
               conv(ks[1], f0, f0, 1, n),
               conv(ks[2], f0, f0, n, 1),
               conv(ks[3], f0, f0, 1, n),
               conv(ks[4], f0, f0, n, 1)],
        "b2": [conv(ks[5], in_fts, f1, 1, 1),
               conv(ks[6], f1, f1, 1, n),
               conv(ks[7], f1, f1, n, 1)],
        "b3": [conv(ks[8], in_fts, f2, 1, 1)],
        "b4": [conv(ks[9], in_fts, f3, 1, 1)],
    }
    return params


# ----------------------------------------------------------------------------
# Forward pass (matches Inceptionx5.forward; NCHW in / NCHW out)
# ----------------------------------------------------------------------------
def inceptionx5_forward(x_nchw, params, n=7):
    x = jnp.transpose(x_nchw, (0, 2, 3, 1))  # -> NHWC for the kernels

    (w10, b10) = params["b1"][0]
    (w20, b20) = params["b2"][0]
    (w30, b30) = params["b3"][0]
    (w40, b40) = params["b4"][0]
    f0, f1, f2 = w10.shape[1], w20.shape[1], w30.shape[1]

    # ---- all four 1x1 convs fused into ONE gridded GEMM over x -------------
    # branch3's 1x1 commutes with the (linear) average pool; it is applied
    # bias-free here and its bias is added after pooling (exact, incl. the
    # zero padding of count_include_pad).
    w_cat = jnp.concatenate([w10, w20, w30, w40], axis=1)
    b_cat = jnp.concatenate([b10, b20, jnp.zeros_like(b30), b40])
    y = conv1x1_fused(x, w_cat, b_cat)
    t1 = y[..., :f0]
    t2 = y[..., f0:f0 + f1]
    y3 = y[..., f0 + f1:f0 + f1 + f2]
    o4 = y[..., f0 + f1 + f2:]

    # branch1 tail: (1,n) -> (n,1) -> (1,n) -> (n,1)
    t1 = conv1xn(t1, *params["b1"][1])
    t1 = convnx1(t1, *params["b1"][2])
    t1 = conv1xn(t1, *params["b1"][3])
    o1 = convnx1(t1, *params["b1"][4])

    # branch2 tail: (1,n) -> (n,1)
    t2 = conv1xn(t2, *params["b2"][1])
    o2 = convnx1(t2, *params["b2"][2])

    # branch3 tail: avgpool 3x3 s1 p1 (count_include_pad) + bias, one kernel
    o3 = _pallas_avgpool3x3_bias(y3, b30)

    y = jnp.concatenate([o1, o2, o3, o4], axis=-1)  # channel concat (dim=1 NCHW)
    return jnp.transpose(y, (0, 3, 1, 2))           # back to NCHW


# ----------------------------------------------------------------------------
# Pure-JAX reference (for correctness check)
# ----------------------------------------------------------------------------
def _ref_conv(x, w_hwio, b, pad_hw):
    y = jax.lax.conv_general_dilated(
        x, w_hwio, window_strides=(1, 1), padding=pad_hw,
        dimension_numbers=("NHWC", "HWIO", "NHWC"))
    return y + b


def _ref_forward(x_nchw, params, n=7):
    x = jnp.transpose(x_nchw, (0, 2, 3, 1))
    pad = n // 2

    def c11(x, w, b):
        return _ref_conv(x, w[None, None], b, ((0, 0), (0, 0)))

    def c1n(x, w, b):
        return _ref_conv(x, w[None], b, ((0, 0), (pad, pad)))

    def cn1(x, w, b):
        return _ref_conv(x, w[:, None], b, ((pad, pad), (0, 0)))

    t = c11(x, *params["b1"][0]); t = c1n(t, *params["b1"][1])
    t = cn1(t, *params["b1"][2]); t = c1n(t, *params["b1"][3])
    o1 = cn1(t, *params["b1"][4])

    t = c11(x, *params["b2"][0]); t = c1n(t, *params["b2"][1])
    o2 = cn1(t, *params["b2"][2])

    pooled = jax.lax.reduce_window(
        x, 0.0, jax.lax.add, (1, 3, 3, 1), (1, 1, 1, 1),
        ((0, 0), (1, 1), (1, 1), (0, 0))) / 9.0  # count_include_pad=True
    o3 = c11(pooled, *params["b3"][0])

    o4 = c11(x, *params["b4"][0])

    y = jnp.concatenate([o1, o2, o3, o4], axis=-1)
    return jnp.transpose(y, (0, 3, 1, 2))


# ----------------------------------------------------------------------------
if __name__ == "__main__":
    key = jax.random.PRNGKey(0)
    k_x, k_p = jax.random.split(key)

    N, in_fts, H, W = 2, 4, 16, 16
    out_fts = [4, 6, 3, 5]
    n = 7

    x = jax.random.normal(k_x, (N, in_fts, H, W), jnp.float32)  # NCHW, like torch
    params = init_params(k_p, in_fts, out_fts, n=n)

    fwd = jax.jit(functools.partial(inceptionx5_forward, n=n))
    out = fwd(x, params)
    out = jax.block_until_ready(out)

    expected_shape = (N, sum(out_fts), H, W)
    assert out.shape == expected_shape, (out.shape, expected_shape)

    ref = jax.block_until_ready(_ref_forward(x, params, n=n))
    np.testing.assert_allclose(np.asarray(out), np.asarray(ref),
                               rtol=1e-4, atol=1e-4)

    print("KERNEL_OK")
</pallas_src>

<mosaic_0001>
module attributes {stable_mosaic.version = 11 : i64} {
  func.func @_matmul_bias_kernel(%arg0: i32, %arg1: memref<256x4xf32, #tpu.memory_space<vmem>>, %arg2: memref<4x18xf32, #tpu.memory_space<vmem>>, %arg3: memref<1x18xf32, #tpu.memory_space<vmem>>, %arg4: memref<256x18xf32, #tpu.memory_space<vmem>>) attributes {dimension_semantics = [#tpu.dimension_semantics<parallel>], iteration_bounds = array<i64: 2>, scalar_prefetch = 0 : i64, scratch_operands = 0 : i64, tpu.core_type = #tpu.core_type<tc>, window_params = [{transform_indices = @transform_0, window_bounds = array<i64: 256, 4>}, {pipeline_mode = #tpu.pipeline_mode<synchronous>, transform_indices = @transform_1, window_bounds = array<i64: 4, 18>}, {pipeline_mode = #tpu.pipeline_mode<synchronous>, transform_indices = @transform_2, window_bounds = array<i64: 1, 18>}, {transform_indices = @transform_3, window_bounds = array<i64: 256, 18>}]} {
    %c0 = arith.constant 0 : index
    %c0_0 = arith.constant 0 : index
    %0 = vector.load %arg1[%c0, %c0_0] : memref<256x4xf32, #tpu.memory_space<vmem>>, vector<256x4xf32>
    %c0_1 = arith.constant 0 : index
    %c0_2 = arith.constant 0 : index
    %1 = vector.load %arg2[%c0_1, %c0_2] : memref<4x18xf32, #tpu.memory_space<vmem>>, vector<4x18xf32>
    %cst = arith.constant dense<0.000000e+00> : vector<256x18xf32>
    %2 = tpu.matmul %0, %1, %cst {dimension_numbers = #tpu.dot_dimension_numbers<[1], [0], [0], [1], [0, 0, 1, 1], [], []>} : vector<256x4xf32>, vector<4x18xf32>, vector<256x18xf32> -> vector<256x18xf32>
    %c0_3 = arith.constant 0 : index
    %c0_4 = arith.constant 0 : index
    %3 = vector.load %arg3[%c0_3, %c0_4] : memref<1x18xf32, #tpu.memory_space<vmem>>, vector<1x18xf32>
    %4 = vector.broadcast %3 : vector<1x18xf32> to vector<256x18xf32>
    %5 = arith.addf %2, %4 : vector<256x18xf32>
    %c0_5 = arith.constant 0 : index
    %c0_6 = arith.constant 0 : index
    %6 = vector.load %arg4[%c0_5, %c0_6] : memref<256x18xf32, #tpu.memory_space<vmem>>, vector<256x18xf32>
    tpu.vector_store %arg4[%c0_5, %c0_6], %5 {strides = array<i32>} : memref<256x18xf32, #tpu.memory_space<vmem>>, vector<256x18xf32>,
    return
  }
  func.func @transform_0(%arg0: i32) -> (i32, i32) {
    %c0_i32 = arith.constant 0 : i32
    %c0_i32_0 = arith.constant 0 : i32
    return %arg0, %c0_i32 : i32, i32
  }
  func.func @transform_1(%arg0: i32) -> (i32, i32) {
    %c0_i32 = arith.constant 0 : i32
    %c0_i32_0 = arith.constant 0 : i32
    %c0_i32_1 = arith.constant 0 : i32
    return %c0_i32, %c0_i32_0 : i32, i32
  }
  func.func @transform_2(%arg0: i32) -> (i32, i32) {
    %c0_i32 = arith.constant 0 : i32
    %c0_i32_0 = arith.constant 0 : i32
    %c0_i32_1 = arith.constant 0 : i32
    return %c0_i32, %c0_i32_0 : i32, i32
  }
  func.func @transform_3(%arg0: i32) -> (i32, i32) {
    %c0_i32 = arith.constant 0 : i32
    %c0_i32_0 = arith.constant 0 : i32
    return %arg0, %c0_i32 : i32, i32
  }
}

module attributes {stable_mosaic.version = 11 : i64} {
  func.func @_sepconv1d_kernel(%arg0: i32, %arg1: memref<16x16x4xf32, #tpu.memory_space<vmem>>, %arg2: memref<7x4x4xf32, #tpu.memory_space<vmem>>, %arg3: memref<1x4xf32, #tpu.memory_space<vmem>>, %arg4: memref<16x16x4xf32, #tpu.memory_space<vmem>>, %arg5: memref<22x4xf32, #tpu.memory_space<vmem>>) attributes {dimension_semantics = [#tpu.dimension_semantics<parallel>], iteration_bounds = array<i64: 2>, scalar_prefetch = 0 : i64, scratch_operands = 1 : i64, tpu.core_type = #tpu.core_type<tc>, window_params = [{transform_indices = @transform_0, window_bounds = array<i64: 16, 16, 4>}, {pipeline_mode = #tpu.pipeline_mode<synchronous>, transform_indices = @transform_1, window_bounds = array<i64: 7, 4, 4>}, {pipeline_mode = #tpu.pipeline_mode<synchronous>, transform_indices = @transform_2, window_bounds = array<i64: 1, 4>}, {transform_indices = @transform_3, window_bounds = array<i64: 16, 16, 4>}]} {
    %cst = arith.constant 0.000000e+00 : f32
    %0 = vector.broadcast %cst : f32 to vector<22x4xf32>
    %c0 = arith.constant 0 : index
    %c0_0 = arith.constant 0 : index
    %1 = vector.load %arg5[%c0, %c0_0] : memref<22x4xf32, #tpu.memory_space<vmem>>, vector<22x4xf32>
    tpu.vector_store %arg5[%c0, %c0_0], %0 {strides = array<i32>} : memref<22x4xf32, #tpu.memory_space<vmem>>, vector<22x4xf32>,
    %c0_i32 = arith.constant 0 : i32
    %c16_i32 = arith.constant 16 : i32
    %2 = arith.addi %c0_i32, %c16_i32 : i32
    %c1_i32 = arith.constant 1 : i32
    scf.for %arg6 = %c0_i32 to %2 step %c1_i32  : i32 {
      %3 = arith.index_cast %arg6 : i32 to index
      %c0_2 = arith.constant 0 : index
      %c0_3 = arith.constant 0 : index
      %4 = vector.load %arg1[%3, %c0_2, %c0_3] : memref<16x16x4xf32, #tpu.memory_space<vmem>>, vector<1x16x4xf32>
      %5 = vector.shape_cast %4 : vector<1x16x4xf32> to vector<16x4xf32>
      %c3 = arith.constant 3 : index
      %c0_4 = arith.constant 0 : index
      %6 = vector.load %arg5[%c3, %c0_4] : memref<22x4xf32, #tpu.memory_space<vmem>>, vector<16x4xf32>
      tpu.vector_store %arg5[%c3, %c0_4], %5 {strides = array<i32>} : memref<22x4xf32, #tpu.memory_space<vmem>>, vector<16x4xf32>,
      %c0_5 = arith.constant 0 : index
      %c0_6 = arith.constant 0 : index
      %7 = vector.load %arg5[%c0_5, %c0_6] : memref<22x4xf32, #tpu.memory_space<vmem>>, vector<16x4xf32>
      %c0_7 = arith.constant 0 : index
      %c0_8 = arith.constant 0 : index
      %c0_9 = arith.constant 0 : index
      %8 = vector.load %arg2[%c0_7, %c0_8, %c0_9] : memref<7x4x4xf32, #tpu.memory_space<vmem>>, vector<1x4x4xf32>
      %9 = vector.shape_cast %8 : vector<1x4x4xf32> to vector<4x4xf32>
      %cst_10 = arith.constant dense<0.000000e+00> : vector<16x4xf32>
      %10 = tpu.matmul %7, %9, %cst_10 {dimension_numbers = #tpu.dot_dimension_numbers<[1], [0], [0], [1], [0, 0, 1, 1], [], []>} : vector<16x4xf32>, vector<4x4xf32>, vector<16x4xf32> -> vector<16x4xf32>
      %c1 = arith.constant 1 : index
      %c0_11 = arith.constant 0 : index
      %11 = vector.load %arg5[%c1, %c0_11] : memref<22x4xf32, #tpu.memory_space<vmem>>, vector<16x4xf32>
      %c1_12 = arith.constant 1 : index
      %c0_13 = arith.constant 0 : index
      %c0_14 = arith.constant 0 : index
      %12 = vector.load %arg2[%c1_12, %c0_13, %c0_14] : memref<7x4x4xf32, #tpu.memory_space<vmem>>, vector<1x4x4xf32>
      %13 = vector.shape_cast %12 : vector<1x4x4xf32> to vector<4x4xf32>
      %cst_15 = arith.constant dense<0.000000e+00> : vector<16x4xf32>
      %14 = tpu.matmul %11, %13, %cst_15 {dimension_numbers = #tpu.dot_dimension_numbers<[1], [0], [0], [1], [0, 0, 1, 1], [], []>} : vector<16x4xf32>, vector<4x4xf32>, vector<16x4xf32> -> vector<16x4xf32>
      %15 = arith.addf %10, %14 : vector<16x4xf32>
      %c2 = arith.constant 2 : index
      %c0_16 = arith.constant 0 : index
      %16 = vector.load %arg5[%c2, %c0_16] : memref<22x4xf32, #tpu.memory_space<vmem>>, vector<16x4xf32>
      %c2_17 = arith.constant 2 : index
      %c0_18 = arith.constant 0 : index
      %c0_19 = arith.constant 0 : index
      %17 = vector.load %arg2[%c2_17, %c0_18, %c0_19] : memref<7x4x4xf32, #tpu.memory_space<vmem>>, vector<1x4x4xf32>
      %18 = vector.shape_cast %17 : vector<1x4x4xf32> to vector<4x4xf32>
      %cst_20 = arith.constant dense<0.000000e+00> : vector<16x4xf32>
      %19 = tpu.matmul %16, %18, %cst_20 {dimension_numbers = #tpu.dot_dimension_numbers<[1], [0], [0], [1], [0, 0, 1, 1], [], []>} : vector<16x4xf32>, vector<4x4xf32>, vector<16x4xf32> -> vector<16x4xf32>
      %20 = arith.addf %15, %19 : vector<16x4xf32>
      %c3_21 = arith.constant 3 : index
      %c0_22 = arith.constant 0 : index
      %21 = vector.load %arg5[%c3_21, %c0_22] : memref<22x4xf32, #tpu.memory_space<vmem>>, vector<16x4xf32>
      %c3_23 = arith.constant 3 : index
      %c0_24 = arith.constant 0 : index
      %c0_25 = arith.constant 0 : index
      %22 = vector.load %arg2[%c3_23, %c0_24, %c0_25] : memref<7x4x4xf32, #tpu.memory_space<vmem>>, vector<1x4x4xf32>
      %23 = vector.shape_cast %22 : vector<1x4x4xf32> to vector<4x4xf32>
      %cst_26 = arith.constant dense<0.000000e+00> : vector<16x4xf32>
      %24 = tpu.matmul %21, %23, %cst_26 {dimension_numbers = #tpu.dot_dimension_numbers<[1], [0], [0], [1], [0, 0, 1, 1], [], []>} : vector<16x4xf32>, vector<4x4xf32>, vector<16x4xf32> -> vector<16x4xf32>
      %25 = arith.addf %20, %24 : vector<16x4xf32>
      %c4 = arith.constant 4 : index
      %c0_27 = arith.constant 0 : index
      %26 = vector.load %arg5[%c4, %c0_27] : memref<22x4xf32, #tpu.memory_space<vmem>>, vector<16x4xf32>
      %c4_28 = arith.constant 4 : index
      %c0_29 = arith.constant 0 : index
      %c0_30 = arith.constant 0 : index
      %27 = vector.load %arg2[%c4_28, %c0_29, %c0_30] : memref<7x4x4xf32, #tpu.memory_space<vmem>>, vector<1x4x4xf32>
      %28 = vector.shape_cast %27 : vector<1x4x4xf32> to vector<4x4xf32>
      %cst_31 = arith.constant dense<0.000000e+00> : vector<16x4xf32>
      %29 = tpu.matmul %26, %28, %cst_31 {dimension_numbers = #tpu.dot_dimension_numbers<[1], [0], [0], [1], [0, 0, 1, 1], [], []>} : vector<16x4xf32>, vector<4x4xf32>, vector<16x4xf32> -> vector<16x4xf32>
      %30 = arith.addf %25, %29 : vector<16x4xf32>
      %c5 = arith.constant 5 : index
      %c0_32 = arith.constant 0 : index
      %31 = vector.load %arg5[%c5, %c0_32] : memref<22x4xf32, #tpu.memory_space<vmem>>, vector<16x4xf32>
      %c5_33 = arith.constant 5 : index
      %c0_34 = arith.constant 0 : index
      %c0_35 = arith.constant 0 : index
      %32 = vector.load %arg2[%c5_33, %c0_34, %c0_35] : memref<7x4x4xf32, #tpu.memory_space<vmem>>, vector<1x4x4xf32>
      %33 = vector.shape_cast %32 : vector<1x4x4xf32> to vector<4x4xf32>
      %cst_36 = arith.constant dense<0.000000e+00> : vector<16x4xf32>
      %34 = tpu.matmul %31, %33, %cst_36 {dimension_numbers = #tpu.dot_dimension_numbers<[1], [0], [0], [1], [0, 0, 1, 1], [], []>} : vector<16x4xf32>, vector<4x4xf32>, vector<16x4xf32> -> vector<16x4xf32>
      %35 = arith.addf %30, %34 : vector<16x4xf32>
      %c6 = arith.constant 6 : index
      %c0_37 = arith.constant 0 : index
      %36 = vector.load %arg5[%c6, %c0_37] : memref<22x4xf32, #tpu.memory_space<vmem>>, vector<16x4xf32>
      %c6_38 = arith.constant 6 : index
      %c0_39 = arith.constant 0 : index
      %c0_40 = arith.constant 0 : index
      %37 = vector.load %arg2[%c6_38, %c0_39, %c0_40] : memref<7x4x4xf32, #tpu.memory_space<vmem>>, vector<1x4x4xf32>
      %38 = vector.shape_cast %37 : vector<1x4x4xf32> to vector<4x4xf32>
      %cst_41 = arith.constant dense<0.000000e+00> : vector<16x4xf32>
      %39 = tpu.matmul %36, %38, %cst_41 {dimension_numbers = #tpu.dot_dimension_numbers<[1], [0], [0], [1], [0, 0, 1, 1], [], []>} : vector<16x4xf32>, vector<4x4xf32>, vector<16x4xf32> -> vector<16x4xf32>
      %40 = arith.addf %35, %39 : vector<16x4xf32>
      %c0_42 = arith.constant 0 : index
      %c0_43 = arith.constant 0 : index
      %41 = vector.load %arg3[%c0_42, %c0_43] : memref<1x4xf32, #tpu.memory_space<vmem>>, vector<1x4xf32>
      %42 = vector.broadcast %41 : vector<1x4xf32> to vector<16x4xf32>
      %43 = arith.addf %40, %42 : vector<16x4xf32>
      %44 = arith.index_cast %arg6 : i32 to index
      %c0_44 = arith.constant 0 : index
      %c0_45 = arith.constant 0 : index
      %45 = vector.load %arg4[%44, %c0_44, %c0_45] : memref<16x16x4xf32, #tpu.memory_space<vmem>>, vector<1x16x4xf32>
      %46 = vector.shape_cast %45 : vector<1x16x4xf32> to vector<16x4xf32>
      %47 = vector.shape_cast %43 : vector<16x4xf32> to vector<1x16x4xf32>
      tpu.vector_store %arg4[%44, %c0_44, %c0_45], %47 {strides = array<i32>} : memref<16x16x4xf32, #tpu.memory_space<vmem>>, vector<1x16x4xf32>,
    }
    %c16_i32_1 = arith.constant 16 : i32
    return
  }
  func.func @transform_0(%arg0: i32) -> (i32, i32, i32) {
    %c0_i32 = arith.constant 0 : i32
    %c0_i32_0 = arith.constant 0 : i32
    %c0_i32_1 = arith.constant 0 : i32
    return %arg0, %c0_i32, %c0_i32_0 : i32, i32, i32
  }
  func.func @transform_1(%arg0: i32) -> (i32, i32, i32) {
    %c0_i32 = arith.constant 0 : i32
    %c0_i32_0 = arith.constant 0 : i32
    %c0_i32_1 = arith.constant 0 : i32
    %c0_i32_2 = arith.constant 0 : i32
    return %c0_i32, %c0_i32_0, %c0_i32_1 : i32, i32, i32
  }
  func.func @transform_2(%arg0: i32) -> (i32, i32) {
    %c0_i32 = arith.constant 0 : i32
    %c0_i32_0 = arith.constant 0 : i32
    %c0_i32_1 = arith.constant 0 : i32
    return %c0_i32, %c0_i32_0 : i32, i32
  }
  func.func @transform_3(%arg0: i32) -> (i32, i32, i32) {
    %c0_i32 = arith.constant 0 : i32
    %c0_i32_0 = arith.constant 0 : i32
    %c0_i32_1 = arith.constant 0 : i32
    return %arg0, %c0_i32, %c0_i32_0 : i32, i32, i32
  }
}

module attributes {stable_mosaic.version = 11 : i64} {
  func.func @_sepconv1d_kernel(%arg0: i32, %arg1: memref<16x16x6xf32, #tpu.memory_space<vmem>>, %arg2: memref<7x6x6xf32, #tpu.memory_space<vmem>>, %arg3: memref<1x6xf32, #tpu.memory_space<vmem>>, %arg4: memref<16x16x6xf32, #tpu.memory_space<vmem>>, %arg5: memref<22x6xf32, #tpu.memory_space<vmem>>) attributes {dimension_semantics = [#tpu.dimension_semantics<parallel>], iteration_bounds = array<i64: 2>, scalar_prefetch = 0 : i64, scratch_operands = 1 : i64, tpu.core_type = #tpu.core_type<tc>, window_params = [{transform_indices = @transform_0, window_bounds = array<i64: 16, 16, 6>}, {pipeline_mode = #tpu.pipeline_mode<synchronous>, transform_indices = @transform_1, window_bounds = array<i64: 7, 6, 6>}, {pipeline_mode = #tpu.pipeline_mode<synchronous>, transform_indices = @transform_2, window_bounds = array<i64: 1, 6>}, {transform_indices = @transform_3, window_bounds = array<i64: 16, 16, 6>}]} {
    %cst = arith.constant 0.000000e+00 : f32
    %0 = vector.broadcast %cst : f32 to vector<22x6xf32>
    %c0 = arith.constant 0 : index
    %c0_0 = arith.constant 0 : index
    %1 = vector.load %arg5[%c0, %c0_0] : memref<22x6xf32, #tpu.memory_space<vmem>>, vector<22x6xf32>
    tpu.vector_store %arg5[%c0, %c0_0], %0 {strides = array<i32>} : memref<22x6xf32, #tpu.memory_space<vmem>>, vector<22x6xf32>,
    %c0_i32 = arith.constant 0 : i32
    %c16_i32 = arith.constant 16 : i32
    %2 = arith.addi %c0_i32, %c16_i32 : i32
    %c1_i32 = arith.constant 1 : i32
    scf.for %arg6 = %c0_i32 to %2 step %c1_i32  : i32 {
      %3 = arith.index_cast %arg6 : i32 to index
      %c0_2 = arith.constant 0 : index
      %c0_3 = arith.constant 0 : index
      %4 = vector.load %arg1[%3, %c0_2, %c0_3] : memref<16x16x6xf32, #tpu.memory_space<vmem>>, vector<1x16x6xf32>
      %5 = vector.shape_cast %4 : vector<1x16x6xf32> to vector<16x6xf32>
      %c3 = arith.constant 3 : index
      %c0_4 = arith.constant 0 : index
      %6 = vector.load %arg5[%c3, %c0_4] : memref<22x6xf32, #tpu.memory_space<vmem>>, vector<16x6xf32>
      tpu.vector_store %arg5[%c3, %c0_4], %5 {strides = array<i32>} : memref<22x6xf32, #tpu.memory_space<vmem>>, vector<16x6xf32>,
      %c0_5 = arith.constant 0 : index
      %c0_6 = arith.constant 0 : index
      %7 = vector.load %arg5[%c0_5, %c0_6] : memref<22x6xf32, #tpu.memory_space<vmem>>, vector<16x6xf32>
      %c0_7 = arith.constant 0 : index
      %c0_8 = arith.constant 0 : index
      %c0_9 = arith.constant 0 : index
      %8 = vector.load %arg2[%c0_7, %c0_8, %c0_9] : memref<7x6x6xf32, #tpu.memory_space<vmem>>, vector<1x6x6xf32>
      %9 = vector.shape_cast %8 : vector<1x6x6xf32> to vector<6x6xf32>
      %cst_10 = arith.constant dense<0.000000e+00> : vector<16x6xf32>
      %10 = tpu.matmul %7, %9, %cst_10 {dimension_numbers = #tpu.dot_dimension_numbers<[1], [0], [0], [1], [0, 0, 1, 1], [], []>} : vector<16x6xf32>, vector<6x6xf32>, vector<16x6xf32> -> vector<16x6xf32>
      %c1 = arith.constant 1 : index
      %c0_11 = arith.constant 0 : index
      %11 = vector.load %arg5[%c1, %c0_11] : memref<22x6xf32, #tpu.memory_space<vmem>>, vector<16x6xf32>
      %c1_12 = arith.constant 1 : index
      %c0_13 = arith.constant 0 : index
      %c0_14 = arith.constant 0 : index
      %12 = vector.load %arg2[%c1_12, %c0_13, %c0_14] : memref<7x6x6xf32, #tpu.memory_space<vmem>>, vector<1x6x6xf32>
      %13 = vector.shape_cast %12 : vector<1x6x6xf32> to vector<6x6xf32>
      %cst_15 = arith.constant dense<0.000000e+00> : vector<16x6xf32>
      %14 = tpu.matmul %11, %13, %cst_15 {dimension_numbers = #tpu.dot_dimension_numbers<[1], [0], [0], [1], [0, 0, 1, 1], [], []>} : vector<16x6xf32>, vector<6x6xf32>, vector<16x6xf32> -> vector<16x6xf32>
      %15 = arith.addf %10, %14 : vector<16x6xf32>
      %c2 = arith.constant 2 : index
      %c0_16 = arith.constant 0 : index
      %16 = vector.load %arg5[%c2, %c0_16] : memref<22x6xf32, #tpu.memory_space<vmem>>, vector<16x6xf32>
      %c2_17 = arith.constant 2 : index
      %c0_18 = arith.constant 0 : index
      %c0_19 = arith.constant 0 : index
      %17 = vector.load %arg2[%c2_17, %c0_18, %c0_19] : memref<7x6x6xf32, #tpu.memory_space<vmem>>, vector<1x6x6xf32>
      %18 = vector.shape_cast %17 : vector<1x6x6xf32> to vector<6x6xf32>
      %cst_20 = arith.constant dense<0.000000e+00> : vector<16x6xf32>
      %19 = tpu.matmul %16, %18, %cst_20 {dimension_numbers = #tpu.dot_dimension_numbers<[1], [0], [0], [1], [0, 0, 1, 1], [], []>} : vector<16x6xf32>, vector<6x6xf32>, vector<16x6xf32> -> vector<16x6xf32>
      %20 = arith.addf %15, %19 : vector<16x6xf32>
      %c3_21 = arith.constant 3 : index
      %c0_22 = arith.constant 0 : index
      %21 = vector.load %arg5[%c3_21, %c0_22] : memref<22x6xf32, #tpu.memory_space<vmem>>, vector<16x6xf32>
      %c3_23 = arith.constant 3 : index
      %c0_24 = arith.constant 0 : index
      %c0_25 = arith.constant 0 : index
      %22 = vector.load %arg2[%c3_23, %c0_24, %c0_25] : memref<7x6x6xf32, #tpu.memory_space<vmem>>, vector<1x6x6xf32>
      %23 = vector.shape_cast %22 : vector<1x6x6xf32> to vector<6x6xf32>
      %cst_26 = arith.constant dense<0.000000e+00> : vector<16x6xf32>
      %24 = tpu.matmul %21, %23, %cst_26 {dimension_numbers = #tpu.dot_dimension_numbers<[1], [0], [0], [1], [0, 0, 1, 1], [], []>} : vector<16x6xf32>, vector<6x6xf32>, vector<16x6xf32> -> vector<16x6xf32>
      %25 = arith.addf %20, %24 : vector<16x6xf32>
      %c4 = arith.constant 4 : index
      %c0_27 = arith.constant 0 : index
      %26 = vector.load %arg5[%c4, %c0_27] : memref<22x6xf32, #tpu.memory_space<vmem>>, vector<16x6xf32>
      %c4_28 = arith.constant 4 : index
      %c0_29 = arith.constant 0 : index
      %c0_30 = arith.constant 0 : index
      %27 = vector.load %arg2[%c4_28, %c0_29, %c0_30] : memref<7x6x6xf32, #tpu.memory_space<vmem>>, vector<1x6x6xf32>
      %28 = vector.shape_cast %27 : vector<1x6x6xf32> to vector<6x6xf32>
      %cst_31 = arith.constant dense<0.000000e+00> : vector<16x6xf32>
      %29 = tpu.matmul %26, %28, %cst_31 {dimension_numbers = #tpu.dot_dimension_numbers<[1], [0], [0], [1], [0, 0, 1, 1], [], []>} : vector<16x6xf32>, vector<6x6xf32>, vector<16x6xf32> -> vector<16x6xf32>
      %30 = arith.addf %25, %29 : vector<16x6xf32>
      %c5 = arith.constant 5 : index
      %c0_32 = arith.constant 0 : index
      %31 = vector.load %arg5[%c5, %c0_32] : memref<22x6xf32, #tpu.memory_space<vmem>>, vector<16x6xf32>
      %c5_33 = arith.constant 5 : index
      %c0_34 = arith.constant 0 : index
      %c0_35 = arith.constant 0 : index
      %32 = vector.load %arg2[%c5_33, %c0_34, %c0_35] : memref<7x6x6xf32, #tpu.memory_space<vmem>>, vector<1x6x6xf32>
      %33 = vector.shape_cast %32 : vector<1x6x6xf32> to vector<6x6xf32>
      %cst_36 = arith.constant dense<0.000000e+00> : vector<16x6xf32>
      %34 = tpu.matmul %31, %33, %cst_36 {dimension_numbers = #tpu.dot_dimension_numbers<[1], [0], [0], [1], [0, 0, 1, 1], [], []>} : vector<16x6xf32>, vector<6x6xf32>, vector<16x6xf32> -> vector<16x6xf32>
      %35 = arith.addf %30, %34 : vector<16x6xf32>
      %c6 = arith.constant 6 : index
      %c0_37 = arith.constant 0 : index
      %36 = vector.load %arg5[%c6, %c0_37] : memref<22x6xf32, #tpu.memory_space<vmem>>, vector<16x6xf32>
      %c6_38 = arith.constant 6 : index
      %c0_39 = arith.constant 0 : index
      %c0_40 = arith.constant 0 : index
      %37 = vector.load %arg2[%c6_38, %c0_39, %c0_40] : memref<7x6x6xf32, #tpu.memory_space<vmem>>, vector<1x6x6xf32>
      %38 = vector.shape_cast %37 : vector<1x6x6xf32> to vector<6x6xf32>
      %cst_41 = arith.constant dense<0.000000e+00> : vector<16x6xf32>
      %39 = tpu.matmul %36, %38, %cst_41 {dimension_numbers = #tpu.dot_dimension_numbers<[1], [0], [0], [1], [0, 0, 1, 1], [], []>} : vector<16x6xf32>, vector<6x6xf32>, vector<16x6xf32> -> vector<16x6xf32>
      %40 = arith.addf %35, %39 : vector<16x6xf32>
      %c0_42 = arith.constant 0 : index
      %c0_43 = arith.constant 0 : index
      %41 = vector.load %arg3[%c0_42, %c0_43] : memref<1x6xf32, #tpu.memory_space<vmem>>, vector<1x6xf32>
      %42 = vector.broadcast %41 : vector<1x6xf32> to vector<16x6xf32>
      %43 = arith.addf %40, %42 : vector<16x6xf32>
      %44 = arith.index_cast %arg6 : i32 to index
      %c0_44 = arith.constant 0 : index
      %c0_45 = arith.constant 0 : index
      %45 = vector.load %arg4[%44, %c0_44, %c0_45] : memref<16x16x6xf32, #tpu.memory_space<vmem>>, vector<1x16x6xf32>
      %46 = vector.shape_cast %45 : vector<1x16x6xf32> to vector<16x6xf32>
      %47 = vector.shape_cast %43 : vector<16x6xf32> to vector<1x16x6xf32>
      tpu.vector_store %arg4[%44, %c0_44, %c0_45], %47 {strides = array<i32>} : memref<16x16x6xf32, #tpu.memory_space<vmem>>, vector<1x16x6xf32>,
    }
    %c16_i32_1 = arith.constant 16 : i32
    return
  }
  func.func @transform_0(%arg0: i32) -> (i32, i32, i32) {
    %c0_i32 = arith.constant 0 : i32
    %c0_i32_0 = arith.constant 0 : i32
    %c0_i32_1 = arith.constant 0 : i32
    return %arg0, %c0_i32, %c0_i32_0 : i32, i32, i32
  }
  func.func @transform_1(%arg0: i32) -> (i32, i32, i32) {
    %c0_i32 = arith.constant 0 : i32
    %c0_i32_0 = arith.constant 0 : i32
    %c0_i32_1 = arith.constant 0 : i32
    %c0_i32_2 = arith.constant 0 : i32
    return %c0_i32, %c0_i32_0, %c0_i32_1 : i32, i32, i32
  }
  func.func @transform_2(%arg0: i32) -> (i32, i32) {
    %c0_i32 = arith.constant 0 : i32
    %c0_i32_0 = arith.constant 0 : i32
    %c0_i32_1 = arith.constant 0 : i32
    return %c0_i32, %c0_i32_0 : i32, i32
  }
  func.func @transform_3(%arg0: i32) -> (i32, i32, i32) {
    %c0_i32 = arith.constant 0 : i32
    %c0_i32_0 = arith.constant 0 : i32
    %c0_i32_1 = arith.constant 0 : i32
    return %arg0, %c0_i32, %c0_i32_0 : i32, i32, i32
  }
}

module attributes {stable_mosaic.version = 11 : i64} {
  func.func @_avgpool3x3_bias_kernel(%arg0: i32, %arg1: memref<1x16x16x3xf32, #tpu.memory_space<vmem>>, %arg2: memref<1x3xf32, #tpu.memory_space<vmem>>, %arg3: memref<1x16x16x3xf32, #tpu.memory_space<vmem>>, %arg4: memref<18x18x3xf32, #tpu.memory_space<vmem>>) attributes {dimension_semantics = [#tpu.dimension_semantics<parallel>], iteration_bounds = array<i64: 2>, scalar_prefetch = 0 : i64, scratch_operands = 1 : i64, tpu.core_type = #tpu.core_type<tc>, window_params = [{transform_indices = @transform_0, window_bounds = array<i64: 1, 16, 16, 3>}, {pipeline_mode = #tpu.pipeline_mode<synchronous>, transform_indices = @transform_1, window_bounds = array<i64: 1, 3>}, {transform_indices = @transform_2, window_bounds = array<i64: 1, 16, 16, 3>}]} {
    %cst = arith.constant 0.000000e+00 : f32
    %0 = vector.broadcast %cst : f32 to vector<18x18x3xf32>
    %c0 = arith.constant 0 : index
    %c0_0 = arith.constant 0 : index
    %c0_1 = arith.constant 0 : index
    %1 = vector.load %arg4[%c0, %c0_0, %c0_1] : memref<18x18x3xf32, #tpu.memory_space<vmem>>, vector<18x18x3xf32>
    tpu.vector_store %arg4[%c0, %c0_0, %c0_1], %0 {strides = array<i32>} : memref<18x18x3xf32, #tpu.memory_space<vmem>>, vector<18x18x3xf32>,
    %c0_2 = arith.constant 0 : index
    %c0_3 = arith.constant 0 : index
    %c0_4 = arith.constant 0 : index
    %c0_5 = arith.constant 0 : index
    %2 = vector.load %arg1[%c0_2, %c0_3, %c0_4, %c0_5] : memref<1x16x16x3xf32, #tpu.memory_space<vmem>>, vector<1x16x16x3xf32>
    %3 = vector.shape_cast %2 : vector<1x16x16x3xf32> to vector<16x16x3xf32>
    %c1 = arith.constant 1 : index
    %c1_6 = arith.constant 1 : index
    %c0_7 = arith.constant 0 : index
    %4 = vector.load %arg4[%c1, %c1_6, %c0_7] : memref<18x18x3xf32, #tpu.memory_space<vmem>>, vector<16x16x3xf32>
    tpu.vector_store %arg4[%c1, %c1_6, %c0_7], %3 {strides = array<i32>} : memref<18x18x3xf32, #tpu.memory_space<vmem>>, vector<16x16x3xf32>,
    %c0_8 = arith.constant 0 : index
    %c0_9 = arith.constant 0 : index
    %c0_10 = arith.constant 0 : index
    %5 = vector.load %arg4[%c0_8, %c0_9, %c0_10] : memref<18x18x3xf32, #tpu.memory_space<vmem>>, vector<16x18x3xf32>
    %c1_11 = arith.constant 1 : index
    %c0_12 = arith.constant 0 : index
    %c0_13 = arith.constant 0 : index
    %6 = vector.load %arg4[%c1_11, %c0_12, %c0_13] : memref<18x18x3xf32, #tpu.memory_space<vmem>>, vector<16x18x3xf32>
    %7 = arith.addf %5, %6 : vector<16x18x3xf32>
    %c2 = arith.constant 2 : index
    %c0_14 = arith.constant 0 : index
    %c0_15 = arith.constant 0 : index
    %8 = vector.load %arg4[%c2, %c0_14, %c0_15] : memref<18x18x3xf32, #tpu.memory_space<vmem>>, vector<16x18x3xf32>
    %9 = arith.addf %7, %8 : vector<16x18x3xf32>
    %10 = vector.extract_strided_slice %9 {offsets = [0, 0, 0], sizes = [16, 16, 3], strides = [1, 1, 1]} : vector<16x18x3xf32> to vector<16x16x3xf32>
    %11 = vector.extract_strided_slice %9 {offsets = [0, 1, 0], sizes = [16, 16, 3], strides = [1, 1, 1]} : vector<16x18x3xf32> to vector<16x16x3xf32>
    %12 = arith.addf %10, %11 : vector<16x16x3xf32>
    %13 = vector.extract_strided_slice %9 {offsets = [0, 2, 0], sizes = [16, 16, 3], strides = [1, 1, 1]} : vector<16x18x3xf32> to vector<16x16x3xf32>
    %14 = arith.addf %12, %13 : vector<16x16x3xf32>
    %cst_16 = arith.constant 0.111111112 : f32
    %15 = vector.broadcast %cst_16 : f32 to vector<16x16x3xf32>
    %16 = arith.mulf %14, %15 : vector<16x16x3xf32>
    %c0_17 = arith.constant 0 : index
    %c0_18 = arith.constant 0 : index
    %17 = vector.load %arg2[%c0_17, %c0_18] : memref<1x3xf32, #tpu.memory_space<vmem>>, vector<1x3xf32>
    %18 = vector.shape_cast %17 : vector<1x3xf32> to vector<1x1x3xf32>
    %19 = vector.broadcast %18 : vector<1x1x3xf32> to vector<16x16x3xf32>
    %20 = arith.addf %16, %19 : vector<16x16x3xf32>
    %c0_19 = arith.constant 0 : index
    %c0_20 = arith.constant 0 : index
    %c0_21 = arith.constant 0 : index
    %c0_22 = arith.constant 0 : index
    %21 = vector.load %arg3[%c0_19, %c0_20, %c0_21, %c0_22] : memref<1x16x16x3xf32, #tpu.memory_space<vmem>>, vector<1x16x16x3xf32>
    %22 = vector.shape_cast %21 : vector<1x16x16x3xf32> to vector<16x16x3xf32>
    %23 = vector.shape_cast %20 : vector<16x16x3xf32> to vector<1x16x16x3xf32>
    tpu.vector_store %arg3[%c0_19, %c0_20, %c0_21, %c0_22], %23 {strides = array<i32>} : memref<1x16x16x3xf32, #tpu.memory_space<vmem>>, vector<1x16x16x3xf32>,
    return
  }
  func.func @transform_0(%arg0: i32) -> (i32, i32, i32, i32) {
    %c0_i32 = arith.constant 0 : i32
    %c0_i32_0 = arith.constant 0 : i32
    %c0_i32_1 = arith.constant 0 : i32
    %c0_i32_2 = arith.constant 0 : i32
    return %arg0, %c0_i32, %c0_i32_0, %c0_i32_1 : i32, i32, i32, i32
  }
  func.func @transform_1(%arg0: i32) -> (i32, i32) {
    %c0_i32 = arith.constant 0 : i32
    %c0_i32_0 = arith.constant 0 : i32
    %c0_i32_1 = arith.constant 0 : i32
    return %c0_i32, %c0_i32_0 : i32, i32
  }
  func.func @transform_2(%arg0: i32) -> (i32, i32, i32, i32) {
    %c0_i32 = arith.constant 0 : i32
    %c0_i32_0 = arith.constant 0 : i32
    %c0_i32_1 = arith.constant 0 : i32
    %c0_i32_2 = arith.constant 0 : i32
    return %arg0, %c0_i32, %c0_i32_0, %c0_i32_1 : i32, i32, i32, i32
  }
}

</mosaic_0001>

<bundles_post_ra>
// kernel: inceptionx5_forward.8
= control target key start
LH: loop header
LB: loop body
LE: loop exit
PB: predicated region body
PF: predicated region fallthrough
CT: control target
= control target key end

     0   :  { %s795_s12 = smov 0   ;;  %s991_s0 = inlined_call_operand.vmem [shape: f32[512,4], index: 0, kind: input, shape index: {}]   ;;  %s992_s1 = inlined_call_operand.vmem [shape: f32[4,18], index: 1, kind: input, shape index: {}]   ;;  %s993_s2 = inlined_call_operand.vmem [shape: f32[1,18], index: 2, kind: input, shape index: {}]   ;;  %s994_s3 = inlined_call_operand.vmem [shape: f32[512,18], index: 3, kind: output, shape index: {}]  }
   0x1 LB: > { %s629_s13 = sadd.s32 4294967295, %s773_s12   ;;  %p633_p0 = scmp.ge.s32.totalorder %s773_s12, 1  ;;  %s773_s12 = sphi %s795_s12, %s13_s12  }
   0x2   : > { %p138_p1 = scmp.lt.s32.totalorder %s773_s12, 3 }
   0x4   : > { %p139_p2 = pnand %p633_p0, %p138_p1 }
   0x5   : > { %v206_v0 = vld [vmem:[%s992_s1] sm:$0xf] (!%p139_p2)  ;;  %vm311_vm0 = vcmask (!%p139_p2), 1043456   ;;  %s634_s16 = sshll.u32 (!%p139_p2), %s629_s13, 5  ;;  %vm214_vm1 = vcmask (!%p139_p2), 31744   ;;  %vm540_vm2 = vcmask (!%p139_p2), 146432  }
   0x6   : > { %142 = sbr.rel (%p139_p2) target bundleno = 263 (0x107), region = 32  ;;  %707 = vmatprep.subr.msk.mxu0 (!%p139_p2), %vm311_vm0, %v206_v0  ;;  %757 = vmatprep.subr.msk.mxu1 (!%p139_p2), %vm311_vm0, %v206_v0  ;;  %p163_p3 = scmp.lt.s32.totalorder (!%p139_p2), %s634_s16, 63  ;;  %v883_v33 = vld [vmem:[%s993_s2] ss:$0 sm:$0xff] (!%p139_p2) }
   0x7   : > { %708 = vmatpush3.msk.msra.mxu0 (!%p139_p2), %vm311_vm0, %v206_v0  ;;  %758 = vmatpush3.msk.msra.mxu1 (!%p139_p2), %vm311_vm0, %v206_v0 }
   0xd   : > { %s996_s16 = smov (!%p163_p3, %s634_s16), 63 }
   0xe   : > { %s635_s17 = sshll.u32 %s996_s16, 3 }
   0xf   : > { %s814_s20 = scalar_lea.vmem %s991_s0, %s635_s17  ;;  %s890_s25 = scalar_lea.vmem %s994_s3, %s635_s17 }
  0x10   : > { %v174_v1 = vld [vmem:[%s814_s20] sm:$0xff]  ;;  %v175_v3 = vld [vmem:[%s814_s20 + $0x8] sm:$0xff]  ;;  %v176_v5 = vld [vmem:[%s814_s20 + $0x10] sm:$0xff] }
  0x11   : > { %v190_v2 = vld [vmem:[%s814_s20 + $0x80] sm:$0xff]  ;;  %709 = vmatprep.mubr.msk.f32.mxu0 %vm214_vm1, %v174_v1  ;;  %v191_v4 = vld [vmem:[%s814_s20 + $0x88] sm:$0xff]  ;;  %v192_v6 = vld [vmem:[%s814_s20 + $0x90] sm:$0xff] }
  0x12   : > { %733 = vmatprep.mubr.msk.f32.mxu1 %vm214_vm1, %v190_v2  ;;  %710 = vmatmul.mubr.msk.f32.vlgmr.msra.gmra.mrb[0].mxu0 %vm214_vm1, %v175_v3  ;;  %v177_v7 = vld [vmem:[%s814_s20 + $0x18] sm:$0xff]  ;;  %v178_v9 = vld [vmem:[%s814_s20 + $0x20] sm:$0xff]  ;;  %v179_v11 = vld [vmem:[%s814_s20 + $0x28] sm:$0xff] }
  0x13   : > { %734 = vmatmul.mubr.msk.f32.vlgmr.msra.gmra.mrb[0].mxu1 %vm214_vm1, %v191_v4  ;;  %712 = vmatprep.mubr.msk.f32.mxu0 %vm214_vm1, %v176_v5  ;;  %v193_v8 = vld [vmem:[%s814_s20 + $0x98] sm:$0xff]  ;;  %v194_v10 = vld [vmem:[%s814_s20 + $0xa0] sm:$0xff]  ;;  %v195_v12 = vld [vmem:[%s814_s20 + $0xa8] sm:$0xff] }
  0x14   : > { %736 = vmatprep.mubr.msk.f32.mxu1 %vm214_vm1, %v192_v6  ;;  %v180_v13 = vld [vmem:[%s814_s20 + $0x30] sm:$0xff]  ;;  %v181_v15 = vld [vmem:[%s814_s20 + $0x38] sm:$0xff]  ;;  %v182_v17 = vld [vmem:[%s814_s20 + $0x40] sm:$0xff] }
  0x15   : > { %v196_v14 = vld [vmem:[%s814_s20 + $0xb0] sm:$0xff]  ;;  %v197_v16 = vld [vmem:[%s814_s20 + $0xb8] sm:$0xff]  ;;  %v198_v18 = vld [vmem:[%s814_s20 + $0xc0] sm:$0xff] }
  0x16   : > { %713 = vmatmul.mubr.msk.f32.gmra.mrb[2].mxu0 %vm214_vm1, %v177_v7  ;;  %v183_v19 = vld [vmem:[%s814_s20 + $0x48] sm:$0xff]  ;;  %v184_v21 = vld [vmem:[%s814_s20 + $0x50] sm:$0xff]  ;;  %v185_v23 = vld [vmem:[%s814_s20 + $0x58] sm:$0xff] }
  0x17   : > { %737 = vmatmul.mubr.msk.f32.gmra.mrb[2].mxu1 %vm214_vm1, %v193_v8  ;;  %715 = vmatprep.mubr.msk.f32.mxu0 %vm214_vm1, %v178_v9  ;;  %v199_v20 = vld [vmem:[%s814_s20 + $0xc8] sm:$0xff]  ;;  %v200_v22 = vld [vmem:[%s814_s20 + $0xd0] sm:$0xff]  ;;  %v201_v24 = vld [vmem:[%s814_s20 + $0xd8] sm:$0xff] }
  0x18   : > { %739 = vmatprep.mubr.msk.f32.mxu1 %vm214_vm1, %v194_v10  ;;  %v186_v25 = vld [vmem:[%s814_s20 + $0x60] sm:$0xff]  ;;  %v187_v27 = vld [vmem:[%s814_s20 + $0x68] sm:$0xff]  ;;  %v188_v29 = vld [vmem:[%s814_s20 + $0x70] sm:$0xff] }
  0x19   : > { %v202_v26 = vld [vmem:[%s814_s20 + $0xe0] sm:$0xff]  ;;  %v203_v28 = vld [vmem:[%s814_s20 + $0xe8] sm:$0xff]  ;;  %v204_v30 = vld [vmem:[%s814_s20 + $0xf0] sm:$0xff] }
  0x1a   : > { %716 = vmatmul.mubr.msk.f32.gmra.mrb[4].mxu0 %vm214_vm1, %v179_v11  ;;  %v189_v31 = vld [vmem:[%s814_s20 + $0x78] sm:$0xff] }
  0x1b   : > { %740 = vmatmul.mubr.msk.f32.gmra.mrb[4].mxu1 %vm214_vm1, %v195_v12  ;;  %718 = vmatprep.mubr.msk.f32.mxu0 %vm214_vm1, %v180_v13  ;;  %v205_v32 = vld [vmem:[%s814_s20 + $0xf8] sm:$0xff] }
  0x1c   : > { %742 = vmatprep.mubr.msk.f32.mxu1 %vm214_vm1, %v196_v14 }
  0x1e   : > { %719 = vmatmul.mubr.msk.f32.gmra.mrb[6].mxu0 %vm214_vm1, %v181_v15 }
  0x1f   : > { %743 = vmatmul.mubr.msk.f32.gmra.mrb[6].mxu1 %vm214_vm1, %v197_v16  ;;  %721 = vmatprep.mubr.msk.f32.mxu0 %vm214_vm1, %v182_v17 }
  0x20   : > { %745 = vmatprep.mubr.msk.f32.mxu1 %vm214_vm1, %v198_v18 }
  0x22   : > { %722 = vmatmul.mubr.msk.f32.gmra.mrb[8].mxu0 %vm214_vm1, %v183_v19 }
  0x23   : > { %746 = vmatmul.mubr.msk.f32.gmra.mrb[8].mxu1 %vm214_vm1, %v199_v20  ;;  %724 = vmatprep.mubr.msk.f32.mxu0 %vm214_vm1, %v184_v21 }
  0x24   : > { %748 = vmatprep.mubr.msk.f32.mxu1 %vm214_vm1, %v200_v22 }
  0x26   : > { %725 = vmatmul.mubr.msk.f32.gmra.mrb[10].mxu0 %vm214_vm1, %v185_v23 }
  0x27   : > { %749 = vmatmul.mubr.msk.f32.gmra.mrb[10].mxu1 %vm214_vm1, %v201_v24  ;;  %727 = vmatprep.mubr.msk.f32.mxu0 %vm214_vm1, %v186_v25 }
  0x28   : > { %751 = vmatprep.mubr.msk.f32.mxu1 %vm214_vm1, %v202_v26 }
  0x2a   : > { %728 = vmatmul.mubr.msk.f32.gmra.mrb[12].mxu0 %vm214_vm1, %v187_v27 }
  0x2b   : > { %752 = vmatmul.mubr.msk.f32.gmra.mrb[12].mxu1 %vm214_vm1, %v203_v28  ;;  %730 = vmatprep.mubr.msk.f32.mxu0 %vm214_vm1, %v188_v29 }
  0x2c   : > { %754 = vmatprep.mubr.msk.f32.mxu1 %vm214_vm1, %v204_v30 }
  0x2e   : > { %731 = vmatmul.mubr.msk.f32.gmra.mrb[14].mxu0 %vm214_vm1, %v189_v31 }
  0x2f   : > { %755 = vmatmul.mubr.msk.f32.gmra.mrb[14].mxu1 %vm214_vm1, %v205_v32 }
  0xe5   : > { %v711_v34 = vpop.f32.mrb[0].mxu0 }
  0xe6   : > { %v735_v35 = vpop.f32.mrb[0].mxu1  ;;  %v387_v36 = vadd.f32 %v711_v34, %v883_v33  ;;  %v381_v38 = vpop.f32.mrb[1].mxu0 }
  0xe7   : > { %v467_v37 = vadd.f32 %v735_v35, %v883_v33  ;;  %v461_v39 = vpop.f32.mrb[1].mxu1  ;;  %v382_v40 = vadd.f32 %v883_v33, %v381_v38 }
  0xe8   : > { %v462_v41 = vadd.f32 %v883_v33, %v461_v39  ;;  %542 = vst.msk [vmem:[%s890_s25 + $0x8] sm:$0xff] %vm540_vm2, %v387_v36 }
  0xe9   : > { %558 = vst.msk [vmem:[%s890_s25 + $0x88] sm:$0xff] %vm540_vm2, %v467_v37  ;;  %541 = vst.msk [vmem:[%s890_s25] sm:$0xff] %vm540_vm2, %v382_v40  ;;  %v714_v42 = vpop.f32.mrb[2].mxu0 }
  0xea   : > { %557 = vst.msk [vmem:[%s890_s25 + $0x80] sm:$0xff] %vm540_vm2, %v462_v41  ;;  %v738_v43 = vpop.f32.mrb[2].mxu1  ;;  %v397_v44 = vadd.f32 %v714_v42, %v883_v33  ;;  %v391_v46 = vpop.f32.mrb[3].mxu0 }
  0xeb   : > { %v477_v45 = vadd.f32 %v738_v43, %v883_v33  ;;  %v471_v47 = vpop.f32.mrb[3].mxu1  ;;  %v392_v48 = vadd.f32 %v883_v33, %v391_v46 }
  0xec   : > { %v472_v49 = vadd.f32 %v883_v33, %v471_v47  ;;  %544 = vst.msk [vmem:[%s890_s25 + $0x18] sm:$0xff] %vm540_vm2, %v397_v44 }
  0xed   : > { %560 = vst.msk [vmem:[%s890_s25 + $0x98] sm:$0xff] %vm540_vm2, %v477_v45  ;;  %543 = vst.msk [vmem:[%s890_s25 + $0x10] sm:$0xff] %vm540_vm2, %v392_v48  ;;  %v717_v50 = vpop.f32.mrb[4].mxu0 }
  0xee   : > { %559 = vst.msk [vmem:[%s890_s25 + $0x90] sm:$0xff] %vm540_vm2, %v472_v49  ;;  %v741_v51 = vpop.f32.mrb[4].mxu1  ;;  %v407_v52 = vadd.f32 %v717_v50, %v883_v33  ;;  %v401_v54 = vpop.f32.mrb[5].mxu0 }
  0xef   : > { %v487_v53 = vadd.f32 %v741_v51, %v883_v33  ;;  %v481_v55 = vpop.f32.mrb[5].mxu1  ;;  %v402_v56 = vadd.f32 %v883_v33, %v401_v54 }
  0xf0   : > { %v482_v57 = vadd.f32 %v883_v33, %v481_v55  ;;  %546 = vst.msk [vmem:[%s890_s25 + $0x28] sm:$0xff] %vm540_vm2, %v407_v52 }
  0xf1   : > { %562 = vst.msk [vmem:[%s890_s25 + $0xa8] sm:$0xff] %vm540_vm2, %v487_v53  ;;  %545 = vst.msk [vmem:[%s890_s25 + $0x20] sm:$0xff] %vm540_vm2, %v402_v56  ;;  %v720_v58 = vpop.f32.mrb[6].mxu0 }
  0xf2   : > { %561 = vst.msk [vmem:[%s890_s25 + $0xa0] sm:$0xff] %vm540_vm2, %v482_v57  ;;  %v744_v59 = vpop.f32.mrb[6].mxu1  ;;  %v417_v60 = vadd.f32 %v720_v58, %v883_v33  ;;  %v411_v62 = vpop.f32.mrb[7].mxu0 }
  0xf3   : > { %v497_v61 = vadd.f32 %v744_v59, %v883_v33  ;;  %v491_v63 = vpop.f32.mrb[7].mxu1  ;;  %v412_v0 = vadd.f32 %v883_v33, %v411_v62 }
  0xf4   : > { %v492_v1 = vadd.f32 %v883_v33, %v491_v63  ;;  %548 = vst.msk [vmem:[%s890_s25 + $0x38] sm:$0xff] %vm540_vm2, %v417_v60 }
  0xf5   : > { %564 = vst.msk [vmem:[%s890_s25 + $0xb8] sm:$0xff] %vm540_vm2, %v497_v61  ;;  %547 = vst.msk [vmem:[%s890_s25 + $0x30] sm:$0xff] %vm540_vm2, %v412_v0  ;;  %v723_v2 = vpop.f32.mrb[8].mxu0 }
  0xf6   : > { %563 = vst.msk [vmem:[%s890_s25 + $0xb0] sm:$0xff] %vm540_vm2, %v492_v1  ;;  %v747_v3 = vpop.f32.mrb[8].mxu1  ;;  %v427_v4 = vadd.f32 %v723_v2, %v883_v33  ;;  %v421_v6 = vpop.f32.mrb[9].mxu0 }
  0xf7   : > { %v507_v5 = vadd.f32 %v747_v3, %v883_v33  ;;  %v501_v7 = vpop.f32.mrb[9].mxu1  ;;  %v422_v8 = vadd.f32 %v883_v33, %v421_v6 }
  0xf8   : > { %v502_v9 = vadd.f32 %v883_v33, %v501_v7  ;;  %550 = vst.msk [vmem:[%s890_s25 + $0x48] sm:$0xff] %vm540_vm2, %v427_v4 }
  0xf9   : > { %566 = vst.msk [vmem:[%s890_s25 + $0xc8] sm:$0xff] %vm540_vm2, %v507_v5  ;;  %549 = vst.msk [vmem:[%s890_s25 + $0x40] sm:$0xff] %vm540_vm2, %v422_v8  ;;  %v726_v10 = vpop.f32.mrb[10].mxu0 }
  0xfa   : > { %565 = vst.msk [vmem:[%s890_s25 + $0xc0] sm:$0xff] %vm540_vm2, %v502_v9  ;;  %v750_v11 = vpop.f32.mrb[10].mxu1  ;;  %v437_v12 = vadd.f32 %v726_v10, %v883_v33  ;;  %v431_v14 = vpop.f32.mrb[11].mxu0 }
  0xfb   : > { %v517_v13 = vadd.f32 %v750_v11, %v883_v33  ;;  %v511_v15 = vpop.f32.mrb[11].mxu1  ;;  %v432_v16 = vadd.f32 %v883_v33, %v431_v14 }
  0xfc   : > { %v512_v17 = vadd.f32 %v883_v33, %v511_v15  ;;  %552 = vst.msk [vmem:[%s890_s25 + $0x58] sm:$0xff] %vm540_vm2, %v437_v12 }
  0xfd   : > { %568 = vst.msk [vmem:[%s890_s25 + $0xd8] sm:$0xff] %vm540_vm2, %v517_v13  ;;  %551 = vst.msk [vmem:[%s890_s25 + $0x50] sm:$0xff] %vm540_vm2, %v432_v16  ;;  %v729_v18 = vpop.f32.mrb[12].mxu0 }
  0xfe   : > { %567 = vst.msk [vmem:[%s890_s25 + $0xd0] sm:$0xff] %vm540_vm2, %v512_v17  ;;  %v753_v19 = vpop.f32.mrb[12].mxu1  ;;  %v447_v20 = vadd.f32 %v729_v18, %v883_v33  ;;  %v441_v22 = vpop.f32.mrb[13].mxu0 }
  0xff   : > { %v527_v21 = vadd.f32 %v753_v19, %v883_v33  ;;  %v521_v23 = vpop.f32.mrb[13].mxu1  ;;  %v442_v24 = vadd.f32 %v883_v33, %v441_v22 }
 0x100   : > { %v522_v25 = vadd.f32 %v883_v33, %v521_v23  ;;  %554 = vst.msk [vmem:[%s890_s25 + $0x68] sm:$0xff] %vm540_vm2, %v447_v20 }
 0x101   : > { %570 = vst.msk [vmem:[%s890_s25 + $0xe8] sm:$0xff] %vm540_vm2, %v527_v21  ;;  %553 = vst.msk [vmem:[%s890_s25 + $0x60] sm:$0xff] %vm540_vm2, %v442_v24  ;;  %v732_v26 = vpop.f32.mrb[14].mxu0 }
 0x102   : > { %569 = vst.msk [vmem:[%s890_s25 + $0xe0] sm:$0xff] %vm540_vm2, %v522_v25  ;;  %v756_v27 = vpop.f32.mrb[14].mxu1  ;;  %v457_v28 = vadd.f32 %v732_v26, %v883_v33  ;;  %v451_v30 = vpop.f32.mrb[15].mxu0 }
 0x103   : > { %v537_v29 = vadd.f32 %v756_v27, %v883_v33  ;;  %v531_v31 = vpop.f32.mrb[15].mxu1  ;;  %v452_v32 = vadd.f32 %v883_v33, %v451_v30 }
 0x104   : > { %v532_v34 = vadd.f32 %v883_v33, %v531_v31  ;;  %556 = vst.msk [vmem:[%s890_s25 + $0x78] sm:$0xff] %vm540_vm2, %v457_v28 }
 0x105   : > { %572 = vst.msk [vmem:[%s890_s25 + $0xf8] sm:$0xff] %vm540_vm2, %v537_v29  ;;  %555 = vst.msk [vmem:[%s890_s25 + $0x70] sm:$0xff] %vm540_vm2, %v452_v32 }
 0x106   : > { %571 = vst.msk [vmem:[%s890_s25 + $0xf0] sm:$0xff] %vm540_vm2, %v532_v34 }
 0x107 PF: > { %s13_s12 = sadd.s32 1, %s773_s12  }
 0x108   : > { %p10_p4 = scmp.ge.s32.totalorder %s13_s12, 4  }
 0x10a   :  { %12 = sbr.rel (!%p10_p4) target bundleno = 1 (0x1), region = 62 }

// kernel: inceptionx5_forward.9
= control target key start
LH: loop header
LB: loop body
LE: loop exit
PB: predicated region body
PF: predicated region fallthrough
CT: control target
= control target key end

     0   :  { %s1067_s12 = smov 0   ;;  %s1161_s0 = inlined_call_operand.vmem [shape: f32[32,16,4], index: 0, kind: input, shape index: {}]   ;;  %s1162_s1 = inlined_call_operand.vmem [shape: f32[7,4,4], index: 1, kind: input, shape index: {}]   ;;  %s1163_s2 = inlined_call_operand.vmem [shape: f32[1,4], index: 2, kind: input, shape index: {}]   ;;  %s1164_s3 = inlined_call_operand.vmem [shape: f32[32,16,4], index: 3, kind: output, shape index: {}]  }
   0x1 LB: > { %s901_s13 = sadd.s32 4294967295, %s1040_s12   ;;  %p905_p0 = scmp.ge.s32.totalorder %s1040_s12, 1  ;;  %s1040_s12 = sphi %s1067_s12, %s13_s12  }
   0x2   : > { %p139_p1 = scmp.lt.s32.totalorder %s1040_s12, 3 }
   0x4   : > { %p140_p2 = pnand %p905_p0, %p139_p1 }
   0x5   : > { %s906_s14 = sshll.u32 (!%p140_p2), %s901_s13, 4  ;;  %vm179_vm0 = vcmask (!%p140_p2), 31744   ;;  %vm182_vm1 = vcmask (!%p140_p2), 29696   ;;  %v1046_v0 = vmov (!%p140_p2), 0.0   ;;  %s1087_s22 = smov (!%p140_p2), 0  }
   0x6   : > { %143 = sbr.rel (%p140_p2) target bundleno = 271 (0x10f), region = 32  ;;  %p166_p3 = scmp.lt.s32.totalorder (!%p140_p2), %s906_s14, 31  ;;  %180 = vst.msk [vmem:[#allocation2] sm:$0xff] (!%p140_p2), %vm179_vm0, %v1046_v0  ;;  %181 = vst.msk [vmem:[#allocation2 + $0x8] sm:$0xff] (!%p140_p2), %vm179_vm0, %v1046_v0 }
   0x7   : > { %183 = vst.msk [vmem:[#allocation2 + $0x10] sm:$0x3f] (!%p140_p2), %vm182_vm1, %v1046_v0 }
   0xd   : > { %s1166_s14 = smov (!%p166_p3, %s906_s14), 31 }
   0xe   : > { %s943_s15 = sshll.u32 %s1166_s14, 4 }
   0xf   : > { %s1080_s18 = scalar_lea.vmem %s1161_s0, %s943_s15  ;;  %s1085_s21 = scalar_lea.vmem %s1164_s3, %s943_s15 }
  0x10 LB: >> { %vm209_vm2 = vcmask 1043456   ;;  %v924_v1 = vld [vmem:[%s1162_s1 + $0xc] sm:$0xf]  ;;  %v913_v2 = vld [vmem:[%s1162_s1 + $0x4] sm:$0xf]  ;;  %s912_s4 = sshll.u32 %s1044_s22, 4  ;;  %s1044_s22 = sphi %s1087_s22, %s189_s22  }
  0x11   : >> { %981 = vmatprep.subr.msk.mxu0 %vm209_vm2, %v924_v1  ;;  %966 = vmatprep.subr.msk.mxu1 %vm209_vm2, %v913_v2  ;;  %v928_v3 = vld [vmem:[%s1162_s1 + $0x10] sm:$0xf]  ;;  %v198_v4 = vld [vmem:[%s1162_s1] sm:$0xf]  ;;  %s191_s5 = scalar_lea.vmem %s1080_s18, %s912_s4  ;;  %v932_v13 = vld [vmem:[%s1162_s1 + $0x14] sm:$0xf]  ;;  %s831_s15 = scalar_lea.vmem %s1085_s21, %s912_s4 }
  0x12   : >> { %982 = vmatpush3.msk.msra.mxu0 %vm209_vm2, %v924_v1  ;;  %967 = vmatpush3.msk.msra.mxu1 %vm209_vm2, %v913_v2  ;;  %v192_v5 = vld [vmem:[%s191_s5] sm:$0xff]  ;;  %v193_v6 = vld [vmem:[%s191_s5 + $0x8] sm:$0xff]  ;;  %v936_v19 = vld [vmem:[%s1162_s1 + $0x18] sm:$0xf]  ;;  %s189_s22 = sadd.s32 1, %s1044_s22  }
  0x13   : >> { %986 = vmatprep.subr.msk.mxu0 %vm209_vm2, %v928_v3  ;;  %971 = vmatprep.subr.msk.mxu1 %vm209_vm2, %v198_v4  ;;  %194 = vst.msk [vmem:[#allocation2 + $0x3] sm:$0xff] %vm179_vm0, %v192_v5  ;;  %195 = vst.msk [vmem:[#allocation2 + $0xb] sm:$0xff] %vm179_vm0, %v193_v6  ;;  %v920_v14 = vld [vmem:[%s1162_s1 + $0x8] sm:$0xf]  ;;  %v940_v27 = vld [vmem:[%s1163_s2] ss:$0 sm:$0xff] }
  0x14   : >> { %p186_p4 = scmp.ge.s32.totalorder %s189_s22, 16  }
  0x1a   : >> { %v199_v7 = vld [vmem:[#allocation2 + $0x1] sm:$0xff]  ;;  %v200_v9 = vld [vmem:[#allocation2 + $0x9] sm:$0xff] }
  0x1b   : >> { %v462_v8 = vld [vmem:[#allocation2 + $0x3] sm:$0xff]  ;;  %968 = vmatprep.mubr.msk.f32.mxu1 %vm179_vm0, %v199_v7  ;;  %v463_v10 = vld [vmem:[#allocation2 + $0xb] sm:$0xff] }
  0x1c   : >> { %983 = vmatprep.mubr.msk.f32.mxu0 %vm179_vm0, %v462_v8  ;;  %v196_v11 = vld [vmem:[#allocation2] sm:$0xff]  ;;  %969 = vmatmul.mubr.msk.f32.vlgmr.msra.gmra.mrb[0].mxu1 %vm179_vm0, %v200_v9  ;;  %v197_v15 = vld [vmem:[#allocation2 + $0x8] sm:$0xff] }
  0x1d   : >> { %v552_v12 = vld [vmem:[#allocation2 + $0x4] sm:$0xff]  ;;  %984 = vmatmul.mubr.msk.f32.vlgmr.msra.gmra.mrb[0].mxu0 %vm179_vm0, %v463_v10  ;;  %972 = vmatpush3.msk.msra.mxu1 %vm209_vm2, %v198_v4  ;;  %v553_v16 = vld [vmem:[#allocation2 + $0xc] sm:$0xff] }
  0x1e   : >> { %987 = vmatpush3.msk.msra.mxu0 %vm209_vm2, %v928_v3  ;;  %973 = vmatprep.mubr.msk.f32.mxu1 %vm179_vm0, %v196_v11  ;;  %v372_v17 = vld [vmem:[#allocation2 + $0x2] sm:$0xff]  ;;  %v373_v20 = vld [vmem:[#allocation2 + $0xa] sm:$0xff] }
  0x1f   : >> { %988 = vmatprep.mubr.msk.f32.mxu0 %vm179_vm0, %v552_v12  ;;  %991 = vmatprep.subr.msk.mxu0 %vm209_vm2, %v932_v13  ;;  %v642_v18 = vld [vmem:[#allocation2 + $0x5] sm:$0xff]  ;;  %v643_v21 = vld [vmem:[#allocation2 + $0xd] sm:$0xff] }
  0x20   : >> { %976 = vmatprep.subr.msk.mxu1 %vm209_vm2, %v920_v14  ;;  %v732_v22 = vld [vmem:[#allocation2 + $0x6] sm:$0xff]  ;;  %v733_v23 = vld [vmem:[#allocation2 + $0xe] sm:$0xff] }
  0x24   : >> { %974 = vmatmul.mubr.msk.f32.vlgmr.msra.gmra.mrb[0].mxu1 %vm179_vm0, %v197_v15 }
  0x25   : >> { %989 = vmatmul.mubr.msk.f32.vlgmr.msra.gmra.mrb[0].mxu0 %vm179_vm0, %v553_v16  ;;  %977 = vmatpush3.msk.msra.mxu1 %vm209_vm2, %v920_v14 }
  0x26   : >> { %992 = vmatpush3.msk.msra.mxu0 %vm209_vm2, %v932_v13  ;;  %978 = vmatprep.mubr.msk.f32.mxu1 %vm179_vm0, %v372_v17 }
  0x27   : >> { %993 = vmatprep.mubr.msk.f32.mxu0 %vm179_vm0, %v642_v18  ;;  %996 = vmatprep.subr.msk.mxu0 %vm209_vm2, %v936_v19 }
  0x2c   : >> { %979 = vmatmul.mubr.msk.f32.vlgmr.msra.gmra.mrb[0].mxu1 %vm179_vm0, %v373_v20 }
  0x2d   : >> { %994 = vmatmul.mubr.msk.f32.vlgmr.msra.gmra.mrb[0].mxu0 %vm179_vm0, %v643_v21 }
  0x2e   : >> { %997 = vmatpush3.msk.msra.mxu0 %vm209_vm2, %v936_v19  ;;  %998 = vmatprep.mubr.msk.f32.mxu0 %vm179_vm0, %v732_v22 }
  0x35   : >> { %999 = vmatmul.mubr.msk.f32.vlgmr.msra.gmra.mrb[0].mxu0 %vm179_vm0, %v733_v23 }
  0xff   : >> { %v980_v24 = vpop.f32.mrb[0].mxu1 }
 0x100   : >> { %v451_v25 = vpop.f32.mrb[1].mxu1 }
 0x108   : >> { %v1000_v26 = vpop.f32.mrb[0].mxu0  ;;  %188 = sbr.rel (!%p186_p4) target bundleno = 16 (0x10), region = 77 }
 0x109   : >> { %v1001_v28 = vadd.f32 %v1000_v26, %v980_v24  ;;  %v811_v29 = vpop.f32.mrb[1].mxu0 }
 0x10a   : >> { %v1002_v30 = vadd.f32 %v811_v29, %v451_v25 }
 0x10b   : >> { %v830_v31 = vadd.f32 %v1001_v28, %v940_v27 }
 0x10c   : >> { %v829_v32 = vadd.f32 %v1002_v30, %v940_v27 }
 0x10d   : >> { %833 = vst.msk [vmem:[%s831_s15 + $0x8] sm:$0xff] %vm179_vm0, %v830_v31 }
 0x10e   : >> { %832 = vst.msk [vmem:[%s831_s15] sm:$0xff] %vm179_vm0, %v829_v32 }
 0x10f PF: > { %s13_s12 = sadd.s32 1, %s1040_s12  }
 0x110   : > { %p10_p5 = scmp.ge.s32.totalorder %s13_s12, 4  }
 0x112   :  { %12 = sbr.rel (!%p10_p5) target bundleno = 1 (0x1), region = 88 }

// kernel: inceptionx5_forward.13
= control target key start
LH: loop header
LB: loop body
LE: loop exit
PB: predicated region body
PF: predicated region fallthrough
CT: control target
= control target key end

     0   :  { %s1067_s12 = smov 0   ;;  %s1161_s0 = inlined_call_operand.vmem [shape: f32[32,16,6], index: 0, kind: input, shape index: {}]   ;;  %s1162_s1 = inlined_call_operand.vmem [shape: f32[7,6,6], index: 1, kind: input, shape index: {}]   ;;  %s1163_s2 = inlined_call_operand.vmem [shape: f32[1,6], index: 2, kind: input, shape index: {}]   ;;  %s1164_s3 = inlined_call_operand.vmem [shape: f32[32,16,6], index: 3, kind: output, shape index: {}]  }
   0x1 LB: > { %s901_s13 = sadd.s32 4294967295, %s1040_s12   ;;  %p905_p0 = scmp.ge.s32.totalorder %s1040_s12, 1  ;;  %s1040_s12 = sphi %s1067_s12, %s13_s12  }
   0x2   : > { %p139_p1 = scmp.lt.s32.totalorder %s1040_s12, 3 }
   0x4   : > { %p140_p2 = pnand %p905_p0, %p139_p1 }
   0x5   : > { %s906_s14 = sshll.u32 (!%p140_p2), %s901_s13, 4  ;;  %vm179_vm0 = vcmask (!%p140_p2), 48128   ;;  %vm182_vm1 = vcmask (!%p140_p2), 46080   ;;  %v1046_v0 = vmov (!%p140_p2), 0.0   ;;  %s1087_s22 = smov (!%p140_p2), 0  }
   0x6   : > { %143 = sbr.rel (%p140_p2) target bundleno = 272 (0x110), region = 32  ;;  %p166_p3 = scmp.lt.s32.totalorder (!%p140_p2), %s906_s14, 31  ;;  %180 = vst.msk [vmem:[#allocation2] sm:$0xff] (!%p140_p2), %vm179_vm0, %v1046_v0  ;;  %181 = vst.msk [vmem:[#allocation2 + $0x8] sm:$0xff] (!%p140_p2), %vm179_vm0, %v1046_v0 }
   0x7   : > { %183 = vst.msk [vmem:[#allocation2 + $0x10] sm:$0x3f] (!%p140_p2), %vm182_vm1, %v1046_v0 }
   0xd   : > { %s1166_s14 = smov (!%p166_p3, %s906_s14), 31 }
   0xe   : > { %s943_s15 = sshll.u32 %s1166_s14, 4 }
   0xf   : > { %s1080_s18 = scalar_lea.vmem %s1161_s0, %s943_s15  ;;  %s1085_s21 = scalar_lea.vmem %s1164_s3, %s943_s15 }
  0x10 LB: >> { %vm209_vm2 = vcmask 1045504   ;;  %v924_v1 = vld [vmem:[%s1162_s1 + $0x18] sm:$0x3f]  ;;  %v913_v2 = vld [vmem:[%s1162_s1 + $0x8] sm:$0x3f]  ;;  %s912_s4 = sshll.u32 %s1044_s22, 4  ;;  %s1044_s22 = sphi %s1087_s22, %s189_s22  }
  0x11   : >> { %981 = vmatprep.subr.msk.mxu0 %vm209_vm2, %v924_v1  ;;  %966 = vmatprep.subr.msk.mxu1 %vm209_vm2, %v913_v2  ;;  %v928_v3 = vld [vmem:[%s1162_s1 + $0x20] sm:$0x3f]  ;;  %s191_s5 = scalar_lea.vmem %s1080_s18, %s912_s4  ;;  %v932_v13 = vld [vmem:[%s1162_s1 + $0x28] sm:$0x3f]  ;;  %v920_v14 = vld [vmem:[%s1162_s1 + $0x10] sm:$0x3f]  ;;  %s831_s15 = scalar_lea.vmem %s1085_s21, %s912_s4 }
  0x12   : >> { %v198_v4 = vld [vmem:[%s1162_s1] sm:$0x3f]  ;;  %982 = vmatpush3.msk.msra.mxu0 %vm209_vm2, %v924_v1  ;;  %967 = vmatpush3.msk.msra.mxu1 %vm209_vm2, %v913_v2  ;;  %v193_v6 = vld [vmem:[%s191_s5 + $0x8] sm:$0xff]  ;;  %v936_v19 = vld [vmem:[%s1162_s1 + $0x30] sm:$0x3f]  ;;  %s189_s22 = sadd.s32 1, %s1044_s22  }
  0x13   : >> { %986 = vmatprep.subr.msk.mxu0 %vm209_vm2, %v928_v3  ;;  %971 = vmatprep.subr.msk.mxu1 %vm209_vm2, %v198_v4  ;;  %v192_v5 = vld [vmem:[%s191_s5] sm:$0xff]  ;;  %195 = vst.msk [vmem:[#allocation2 + $0xb] sm:$0xff] %vm179_vm0, %v193_v6  ;;  %p186_p4 = scmp.ge.s32.totalorder %s189_s22, 16  }
  0x14   : >> { %194 = vst.msk [vmem:[#allocation2 + $0x3] sm:$0xff] %vm179_vm0, %v192_v5  ;;  %v940_v27 = vld [vmem:[%s1163_s2] ss:$0 sm:$0xff] }
  0x1a   : >> { %v463_v10 = vld [vmem:[#allocation2 + $0xb] sm:$0xff] }
  0x1b   : >> { %v199_v7 = vld [vmem:[#allocation2 + $0x1] sm:$0xff]  ;;  %v200_v9 = vld [vmem:[#allocation2 + $0x9] sm:$0xff] }
  0x1c   : >> { %v462_v8 = vld [vmem:[#allocation2 + $0x3] sm:$0xff]  ;;  %968 = vmatprep.mubr.msk.f32.mxu1 %vm179_vm0, %v199_v7  ;;  %v553_v16 = vld [vmem:[#allocation2 + $0xc] sm:$0xff] }
  0x1d   : >> { %983 = vmatprep.mubr.msk.f32.mxu0 %vm179_vm0, %v462_v8  ;;  %v196_v11 = vld [vmem:[#allocation2] sm:$0xff]  ;;  %969 = vmatmul.mubr.msk.f32.vlgmr.msra.gmra.mrb[0].mxu1 %vm179_vm0, %v200_v9  ;;  %v197_v15 = vld [vmem:[#allocation2 + $0x8] sm:$0xff] }
  0x1e   : >> { %v552_v12 = vld [vmem:[#allocation2 + $0x4] sm:$0xff]  ;;  %984 = vmatmul.mubr.msk.f32.vlgmr.msra.gmra.mrb[0].mxu0 %vm179_vm0, %v463_v10  ;;  %972 = vmatpush3.msk.msra.mxu1 %vm209_vm2, %v198_v4  ;;  %v643_v21 = vld [vmem:[#allocation2 + $0xd] sm:$0xff] }
  0x1f   : >> { %987 = vmatpush3.msk.msra.mxu0 %vm209_vm2, %v928_v3  ;;  %973 = vmatprep.mubr.msk.f32.mxu1 %vm179_vm0, %v196_v11  ;;  %v372_v17 = vld [vmem:[#allocation2 + $0x2] sm:$0xff]  ;;  %v373_v20 = vld [vmem:[#allocation2 + $0xa] sm:$0xff] }
  0x20   : >> { %988 = vmatprep.mubr.msk.f32.mxu0 %vm179_vm0, %v552_v12  ;;  %991 = vmatprep.subr.msk.mxu0 %vm209_vm2, %v932_v13  ;;  %v642_v18 = vld [vmem:[#allocation2 + $0x5] sm:$0xff]  ;;  %v733_v23 = vld [vmem:[#allocation2 + $0xe] sm:$0xff] }
  0x21   : >> { %976 = vmatprep.subr.msk.mxu1 %vm209_vm2, %v920_v14  ;;  %v732_v22 = vld [vmem:[#allocation2 + $0x6] sm:$0xff] }
  0x25   : >> { %974 = vmatmul.mubr.msk.f32.vlgmr.msra.gmra.mrb[0].mxu1 %vm179_vm0, %v197_v15 }
  0x26   : >> { %989 = vmatmul.mubr.msk.f32.vlgmr.msra.gmra.mrb[0].mxu0 %vm179_vm0, %v553_v16  ;;  %977 = vmatpush3.msk.msra.mxu1 %vm209_vm2, %v920_v14 }
  0x27   : >> { %992 = vmatpush3.msk.msra.mxu0 %vm209_vm2, %v932_v13  ;;  %978 = vmatprep.mubr.msk.f32.mxu1 %vm179_vm0, %v372_v17 }
  0x28   : >> { %993 = vmatprep.mubr.msk.f32.mxu0 %vm179_vm0, %v642_v18  ;;  %996 = vmatprep.subr.msk.mxu0 %vm209_vm2, %v936_v19 }
  0x2d   : >> { %979 = vmatmul.mubr.msk.f32.vlgmr.msra.gmra.mrb[0].mxu1 %vm179_vm0, %v373_v20 }
  0x2e   : >> { %994 = vmatmul.mubr.msk.f32.vlgmr.msra.gmra.mrb[0].mxu0 %vm179_vm0, %v643_v21 }
  0x2f   : >> { %997 = vmatpush3.msk.msra.mxu0 %vm209_vm2, %v936_v19  ;;  %998 = vmatprep.mubr.msk.f32.mxu0 %vm179_vm0, %v732_v22 }
  0x36   : >> { %999 = vmatmul.mubr.msk.f32.vlgmr.msra.gmra.mrb[0].mxu0 %vm179_vm0, %v733_v23 }
 0x100   : >> { %v980_v24 = vpop.f32.mrb[0].mxu1 }
 0x101   : >> { %v451_v25 = vpop.f32.mrb[1].mxu1 }
 0x109   : >> { %v1000_v26 = vpop.f32.mrb[0].mxu0  ;;  %188 = sbr.rel (!%p186_p4) target bundleno = 16 (0x10), region = 77 }
 0x10a   : >> { %v1001_v28 = vadd.f32 %v1000_v26, %v980_v24  ;;  %v811_v29 = vpop.f32.mrb[1].mxu0 }
 0x10b   : >> { %v1002_v30 = vadd.f32 %v811_v29, %v451_v25 }
 0x10c   : >> { %v830_v31 = vadd.f32 %v1001_v28, %v940_v27 }
 0x10d   : >> { %v829_v32 = vadd.f32 %v1002_v30, %v940_v27 }
 0x10e   : >> { %833 = vst.msk [vmem:[%s831_s15 + $0x8] sm:$0xff] %vm179_vm0, %v830_v31 }
 0x10f   : >> { %832 = vst.msk [vmem:[%s831_s15] sm:$0xff] %vm179_vm0, %v829_v32 }
 0x110 PF: > { %s13_s12 = sadd.s32 1, %s1040_s12  }
 0x111   : > { %p10_p5 = scmp.ge.s32.totalorder %s13_s12, 4  }
 0x113   :  { %12 = sbr.rel (!%p10_p5) target bundleno = 1 (0x1), region = 88 }

// kernel: inceptionx5_forward.15
= control target key start
LH: loop header
LB: loop body
LE: loop exit
PB: predicated region body
PF: predicated region fallthrough
CT: control target
= control target key end

     0   :  { %s1049_s9 = smov 0   ;;  %s1380_s0 = inlined_call_operand.vmem [shape: f32[2,16,16,3], index: 0, kind: input, shape index: {}]   ;;  %s1381_s1 = inlined_call_operand.vmem [shape: f32[1,3], index: 1, kind: input, shape index: {}]   ;;  %s1382_s2 = inlined_call_operand.vmem [shape: f32[2,16,16,3], index: 2, kind: output, shape index: {}]  }
   0x1 LB: > { %s1002_s10 = sadd.s32 4294967295, %s1031_s9   ;;  %p1006_p0 = scmp.ge.s32.totalorder %s1031_s9, 1  ;;  %s1031_s9 = sphi %s1049_s9, %s12_s9  }
   0x2   : > { %p112_p1 = scmp.lt.s32.totalorder %s1031_s9, 3 }
   0x4   : > { %p113_p2 = pnand %p1006_p0, %p112_p1 }
   0x5   : > { %vm144_vm0 = vcmask (!%p113_p2), 23552   ;;  %vm147_vm1 = vcmask (!%p113_p2), 17408   ;;  %p1059_p3 = scmp.lt.s32.totalorder (!%p113_p2), %s1002_s10, 1  ;;  %v1033_v0 = vmov (!%p113_p2), 0.0   ;;  %vm554_vm2 = vcmask (!%p113_p2), 1046528  }
   0x6   : > { %116 = sbr.rel (%p113_p2) target bundleno = 148 (0x94), region = 28  ;;  %149 = vst.msk [vmem:[#allocation2 + $0x18] sm:$0xff] (!%p113_p2), %vm144_vm0, %v1033_v0  ;;  %145 = vst.msk [vmem:[#allocation2] sm:$0xff] (!%p113_p2), %vm144_vm0, %v1033_v0  ;;  %vm699_vm3 = vcmask (!%p113_p2), 1045504  }
   0x7   : > { %146 = vst.msk [vmem:[#allocation2 + $0x8] sm:$0xff] (!%p113_p2), %vm144_vm0, %v1033_v0  ;;  %150 = vst.msk [vmem:[#allocation2 + $0x20] sm:$0xff] (!%p113_p2), %vm144_vm0, %v1033_v0 }
   0x8   : > { %152 = vst.msk [vmem:[#allocation2 + $0x30] sm:$0xff] (!%p113_p2), %vm144_vm0, %v1033_v0  ;;  %153 = vst.msk [vmem:[#allocation2 + $0x38] sm:$0xff] (!%p113_p2), %vm144_vm0, %v1033_v0 }
   0x9   : > { %155 = vst.msk [vmem:[#allocation2 + $0x48] sm:$0xff] (!%p113_p2), %vm144_vm0, %v1033_v0  ;;  %156 = vst.msk [vmem:[#allocation2 + $0x50] sm:$0xff] (!%p113_p2), %vm144_vm0, %v1033_v0 }
   0xa   : > { %158 = vst.msk [vmem:[#allocation2 + $0x60] sm:$0xff] (!%p113_p2), %vm144_vm0, %v1033_v0  ;;  %159 = vst.msk [vmem:[#allocation2 + $0x68] sm:$0xff] (!%p113_p2), %vm144_vm0, %v1033_v0 }
   0xb   : > { %161 = vst.msk [vmem:[#allocation2 + $0x78] sm:$0xff] (!%p113_p2), %vm144_vm0, %v1033_v0  ;;  %162 = vst.msk [vmem:[#allocation2 + $0x80] sm:$0xff] (!%p113_p2), %vm144_vm0, %v1033_v0 }
   0xc   : > { %164 = vst.msk [vmem:[#allocation2 + $0x90] sm:$0xff] (!%p113_p2), %vm144_vm0, %v1033_v0  ;;  %165 = vst.msk [vmem:[#allocation2 + $0x98] sm:$0xff] (!%p113_p2), %vm144_vm0, %v1033_v0 }
   0xd   : > { %167 = vst.msk [vmem:[#allocation2 + $0xa8] sm:$0xff] %vm144_vm0, %v1033_v0  ;;  %168 = vst.msk [vmem:[#allocation2 + $0xb0] sm:$0xff] %vm144_vm0, %v1033_v0  ;;  %s1385_s10 = smov (!%p1059_p3, %s1002_s10), 1  ;;  %v265_v33 = vld [vmem:[#allocation2] sm:$0xff] }
   0xe   : > { %170 = vst.msk [vmem:[#allocation2 + $0xc0] sm:$0xff] %vm144_vm0, %v1033_v0  ;;  %171 = vst.msk [vmem:[#allocation2 + $0xc8] sm:$0xff] %vm144_vm0, %v1033_v0  ;;  %s1014_s12 = sshll.u32 %s1385_s10, 8  ;;  %v266_v34 = vld [vmem:[#allocation2 + $0x8] sm:$0xff] }
   0xf   : > { %173 = vst.msk [vmem:[#allocation2 + $0xd8] sm:$0xff] %vm144_vm0, %v1033_v0  ;;  %174 = vst.msk [vmem:[#allocation2 + $0xe0] sm:$0xff] %vm144_vm0, %v1033_v0  ;;  %s1129_s15 = scalar_lea.vmem %s1380_s0, %s1014_s12  ;;  %s1221_s20 = scalar_lea.vmem %s1382_s2, %s1014_s12 }
  0x10   : > { %176 = vst.msk [vmem:[#allocation2 + $0xf0] sm:$0xff] %vm144_vm0, %v1033_v0  ;;  %177 = vst.msk [vmem:[#allocation2 + $0xf8] sm:$0xff] %vm144_vm0, %v1033_v0  ;;  %v200_v1 = vld [vmem:[%s1129_s15] sm:$0xff]  ;;  %v201_v2 = vld [vmem:[%s1129_s15 + $0x8] sm:$0xff] }
  0x11   : > { %179 = vst.msk [vmem:[#allocation2 + $0x108] sm:$0xff] %vm144_vm0, %v1033_v0  ;;  %180 = vst.msk [vmem:[#allocation2 + $0x110] sm:$0xff] %vm144_vm0, %v1033_v0  ;;  %v202_v3 = vld [vmem:[%s1129_s15 + $0x10] sm:$0xff]  ;;  %v203_v4 = vld [vmem:[%s1129_s15 + $0x18] sm:$0xff] }
  0x12   : > { %182 = vst.msk [vmem:[#allocation2 + $0x120] sm:$0xff] %vm144_vm0, %v1033_v0  ;;  %183 = vst.msk [vmem:[#allocation2 + $0x128] sm:$0xff] %vm144_vm0, %v1033_v0  ;;  %v204_v5 = vld [vmem:[%s1129_s15 + $0x20] sm:$0xff]  ;;  %v205_v6 = vld [vmem:[%s1129_s15 + $0x28] sm:$0xff] }
  0x13   : > { %185 = vst.msk [vmem:[#allocation2 + $0x138] sm:$0xff] %vm144_vm0, %v1033_v0  ;;  %186 = vst.msk [vmem:[#allocation2 + $0x140] sm:$0xff] %vm144_vm0, %v1033_v0  ;;  %v206_v7 = vld [vmem:[%s1129_s15 + $0x30] sm:$0xff]  ;;  %v207_v8 = vld [vmem:[%s1129_s15 + $0x38] sm:$0xff] }
  0x14   : > { %188 = vst.msk [vmem:[#allocation2 + $0x150] sm:$0xff] %vm144_vm0, %v1033_v0  ;;  %189 = vst.msk [vmem:[#allocation2 + $0x158] sm:$0xff] %vm144_vm0, %v1033_v0  ;;  %v208_v9 = vld [vmem:[%s1129_s15 + $0x40] sm:$0xff]  ;;  %v209_v10 = vld [vmem:[%s1129_s15 + $0x48] sm:$0xff] }
  0x15   : > { %191 = vst.msk [vmem:[#allocation2 + $0x168] sm:$0xff] %vm144_vm0, %v1033_v0  ;;  %192 = vst.msk [vmem:[#allocation2 + $0x170] sm:$0xff] %vm144_vm0, %v1033_v0  ;;  %v210_v11 = vld [vmem:[%s1129_s15 + $0x50] sm:$0xff]  ;;  %v211_v12 = vld [vmem:[%s1129_s15 + $0x58] sm:$0xff] }
  0x16   : > { %194 = vst.msk [vmem:[#allocation2 + $0x180] sm:$0xff] %vm144_vm0, %v1033_v0  ;;  %195 = vst.msk [vmem:[#allocation2 + $0x188] sm:$0xff] %vm144_vm0, %v1033_v0  ;;  %v212_v13 = vld [vmem:[%s1129_s15 + $0x60] sm:$0xff]  ;;  %v213_v14 = vld [vmem:[%s1129_s15 + $0x68] sm:$0xff] }
  0x17   : > { %197 = vst.msk [vmem:[#allocation2 + $0x198] sm:$0xff] %vm144_vm0, %v1033_v0  ;;  %198 = vst.msk [vmem:[#allocation2 + $0x1a0] sm:$0xff] %vm144_vm0, %v1033_v0  ;;  %v214_v15 = vld [vmem:[%s1129_s15 + $0x70] sm:$0xff]  ;;  %v215_v16 = vld [vmem:[%s1129_s15 + $0x78] sm:$0xff] }
  0x18   : > { %151 = vst.msk [vmem:[#allocation2 + $0x28] sm:$0x3] %vm147_vm1, %v1033_v0  ;;  %148 = vst.msk [vmem:[#allocation2 + $0x10] sm:$0x3] %vm147_vm1, %v1033_v0  ;;  %v216_v17 = vld [vmem:[%s1129_s15 + $0x80] sm:$0xff]  ;;  %v217_v18 = vld [vmem:[%s1129_s15 + $0x88] sm:$0xff] }
  0x19   : > { %154 = vst.msk [vmem:[#allocation2 + $0x40] sm:$0x3] %vm147_vm1, %v1033_v0  ;;  %157 = vst.msk [vmem:[#allocation2 + $0x58] sm:$0x3] %vm147_vm1, %v1033_v0  ;;  %v218_v19 = vld [vmem:[%s1129_s15 + $0x90] sm:$0xff]  ;;  %v219_v20 = vld [vmem:[%s1129_s15 + $0x98] sm:$0xff] }
  0x1a   : > { %160 = vst.msk [vmem:[#allocation2 + $0x70] sm:$0x3] %vm147_vm1, %v1033_v0  ;;  %163 = vst.msk [vmem:[#allocation2 + $0x88] sm:$0x3] %vm147_vm1, %v1033_v0  ;;  %v220_v21 = vld [vmem:[%s1129_s15 + $0xa0] sm:$0xff]  ;;  %v221_v22 = vld [vmem:[%s1129_s15 + $0xa8] sm:$0xff] }
  0x1b   : > { %166 = vst.msk [vmem:[#allocation2 + $0xa0] sm:$0x3] %vm147_vm1, %v1033_v0  ;;  %169 = vst.msk [vmem:[#allocation2 + $0xb8] sm:$0x3] %vm147_vm1, %v1033_v0  ;;  %v222_v23 = vld [vmem:[%s1129_s15 + $0xb0] sm:$0xff]  ;;  %v223_v24 = vld [vmem:[%s1129_s15 + $0xb8] sm:$0xff] }
  0x1c   : > { %172 = vst.msk [vmem:[#allocation2 + $0xd0] sm:$0x3] %vm147_vm1, %v1033_v0  ;;  %175 = vst.msk [vmem:[#allocation2 + $0xe8] sm:$0x3] %vm147_vm1, %v1033_v0  ;;  %v224_v25 = vld [vmem:[%s1129_s15 + $0xc0] sm:$0xff]  ;;  %v225_v26 = vld [vmem:[%s1129_s15 + $0xc8] sm:$0xff] }
  0x1d   : > { %178 = vst.msk [vmem:[#allocation2 + $0x100] sm:$0x3] %vm147_vm1, %v1033_v0  ;;  %181 = vst.msk [vmem:[#allocation2 + $0x118] sm:$0x3] %vm147_vm1, %v1033_v0  ;;  %v226_v27 = vld [vmem:[%s1129_s15 + $0xd0] sm:$0xff]  ;;  %v227_v28 = vld [vmem:[%s1129_s15 + $0xd8] sm:$0xff] }
  0x1e   : > { %184 = vst.msk [vmem:[#allocation2 + $0x130] sm:$0x3] %vm147_vm1, %v1033_v0  ;;  %187 = vst.msk [vmem:[#allocation2 + $0x148] sm:$0x3] %vm147_vm1, %v1033_v0  ;;  %v228_v29 = vld [vmem:[%s1129_s15 + $0xe0] sm:$0xff]  ;;  %v229_v30 = vld [vmem:[%s1129_s15 + $0xe8] sm:$0xff] }
  0x1f   : > { %190 = vst.msk [vmem:[#allocation2 + $0x160] sm:$0x3] %vm147_vm1, %v1033_v0  ;;  %193 = vst.msk [vmem:[#allocation2 + $0x178] sm:$0x3] %vm147_vm1, %v1033_v0  ;;  %v230_v31 = vld [vmem:[%s1129_s15 + $0xf0] sm:$0xff]  ;;  %v231_v32 = vld [vmem:[%s1129_s15 + $0xf8] sm:$0xff] }
  0x20   : > { %196 = vst.msk [vmem:[#allocation2 + $0x190] sm:$0x3] %vm147_vm1, %v1033_v0  ;;  %199 = vst.msk [vmem:[#allocation2 + $0x1a8] sm:$0x3] %vm147_vm1, %v1033_v0  ;;  %v267_v41 = vld [vmem:[#allocation2 + $0x10] sm:$0x3] }
  0x21   : > { %233 = vst.msk [vmem:[#allocation2 + $0x19] sm:$0xff] %vm144_vm0, %v200_v1  ;;  %234 = vst.msk [vmem:[#allocation2 + $0x21] sm:$0xff] %vm144_vm0, %v201_v2 }
  0x22   : > { %235 = vst.msk [vmem:[#allocation2 + $0x31] sm:$0xff] %vm144_vm0, %v202_v3  ;;  %236 = vst.msk [vmem:[#allocation2 + $0x39] sm:$0xff] %vm144_vm0, %v203_v4 }
  0x23   : > { %237 = vst.msk [vmem:[#allocation2 + $0x49] sm:$0xff] %vm144_vm0, %v204_v5  ;;  %238 = vst.msk [vmem:[#allocation2 + $0x51] sm:$0xff] %vm144_vm0, %v205_v6 }
  0x24   : > { %239 = vst.msk [vmem:[#allocation2 + $0x61] sm:$0xff] %vm144_vm0, %v206_v7  ;;  %240 = vst.msk [vmem:[#allocation2 + $0x69] sm:$0xff] %vm144_vm0, %v207_v8 }
  0x25   : > { %241 = vst.msk [vmem:[#allocation2 + $0x79] sm:$0xff] %vm144_vm0, %v208_v9  ;;  %242 = vst.msk [vmem:[#allocation2 + $0x81] sm:$0xff] %vm144_vm0, %v209_v10 }
  0x26   : > { %243 = vst.msk [vmem:[#allocation2 + $0x91] sm:$0xff] %vm144_vm0, %v210_v11  ;;  %244 = vst.msk [vmem:[#allocation2 + $0x99] sm:$0xff] %vm144_vm0, %v211_v12 }
  0x27   : > { %245 = vst.msk [vmem:[#allocation2 + $0xa9] sm:$0xff] %vm144_vm0, %v212_v13  ;;  %246 = vst.msk [vmem:[#allocation2 + $0xb1] sm:$0xff] %vm144_vm0, %v213_v14 }
  0x28   : > { %247 = vst.msk [vmem:[#allocation2 + $0xc1] sm:$0xff] %vm144_vm0, %v214_v15  ;;  %248 = vst.msk [vmem:[#allocation2 + $0xc9] sm:$0xff] %vm144_vm0, %v215_v16  ;;  %v313_v35 = vld [vmem:[#allocation2 + $0x18] sm:$0xff]  ;;  %v314_v36 = vld [vmem:[#allocation2 + $0x20] sm:$0xff] }
  0x29   : > { %249 = vst.msk [vmem:[#allocation2 + $0xd9] sm:$0xff] %vm144_vm0, %v216_v17  ;;  %250 = vst.msk [vmem:[#allocation2 + $0xe1] sm:$0xff] %vm144_vm0, %v217_v18  ;;  %v361_v37 = vadd.f32 %v313_v35, %v265_v33  ;;  %v362_v38 = vadd.f32 %v314_v36, %v266_v34  ;;  %v410_v39 = vld [vmem:[#allocation2 + $0x30] sm:$0xff]  ;;  %v411_v40 = vld [vmem:[#allocation2 + $0x38] sm:$0xff] }
  0x2a   : > { %251 = vst.msk [vmem:[#allocation2 + $0xf1] sm:$0xff] %vm144_vm0, %v218_v19  ;;  %252 = vst.msk [vmem:[#allocation2 + $0xf9] sm:$0xff] %vm144_vm0, %v219_v20  ;;  %v315_v42 = vld [vmem:[#allocation2 + $0x28] sm:$0x3]  ;;  %v364_v43 = vadd.f32 %v410_v39, %v313_v35  ;;  %v365_v44 = vadd.f32 %v411_v40, %v314_v36  ;;  %v1197_v49 = vld [vmem:[#allocation2 + $0x50] sm:$0xff] }
  0x2b   : > { %253 = vst.msk [vmem:[#allocation2 + $0x109] sm:$0xff] %vm144_vm0, %v220_v21  ;;  %254 = vst.msk [vmem:[#allocation2 + $0x111] sm:$0xff] %vm144_vm0, %v221_v22  ;;  %v1195_v45 = vld [vmem:[#allocation2 + $0x48] sm:$0xff]  ;;  %v458_v46 = vadd.f32 %v410_v39, %v361_v37  ;;  %v459_v47 = vadd.f32 %v411_v40, %v362_v38  ;;  %v363_v48 = vadd.f32 %v315_v42, %v267_v41  ;;  %v318_v51 = vld [vmem:[#allocation2 + $0x40] sm:$0x3] }
  0x2c   : > { %255 = vst.msk [vmem:[#allocation2 + $0x121] sm:$0xff] %vm144_vm0, %v222_v23  ;;  %256 = vst.msk [vmem:[#allocation2 + $0x129] sm:$0xff] %vm144_vm0, %v223_v24  ;;  %v270_v50 = vld [vmem:[#allocation2 + $0x28] sm:$0x3]  ;;  %v367_v52 = vadd.f32 %v1195_v45, %v410_v39  ;;  %v461_v53 = vadd.f32 %v1195_v45, %v364_v43  ;;  %v462_v54 = vadd.f32 %v1197_v49, %v365_v44  ;;  %v412_v61 = vld [vmem:[#allocation2 + $0x40] sm:$0x3] }
  0x2d   : > { %257 = vst.msk [vmem:[#allocation2 + $0x139] sm:$0xff] %vm144_vm0, %v224_v25  ;;  %258 = vst.msk [vmem:[#allocation2 + $0x141] sm:$0xff] %vm144_vm0, %v225_v26  ;;  %v366_v55 = vadd.f32 %v318_v51, %v270_v50  ;;  %v368_v56 = vadd.f32 %v1197_v49, %v411_v40  ;;  %v555_v57 = vrot.slane %v458_v46, 1  ;;  %v556_v58 = vrot.slane %v459_v47, 1  ;;  %v415_v2 = vld [vmem:[#allocation2 + $0x58] sm:$0x3] }
  0x2e   : > { %259 = vst.msk [vmem:[#allocation2 + $0x151] sm:$0xff] %vm144_vm0, %v226_v27  ;;  %260 = vst.msk [vmem:[#allocation2 + $0x159] sm:$0xff] %vm144_vm0, %v227_v28  ;;  %v700_v59 = vrot.slane %v458_v46, 2  ;;  %v701_v60 = vrot.slane %v459_v47, 2  ;;  %v460_v62 = vadd.f32 %v412_v61, %v363_v48  ;;  %v560_v63 = vrot.slane %v461_v53, 1  ;;  %v416_v15 = vld [vmem:[#allocation2 + $0x60] sm:$0xff] }
  0x2f   : > { %261 = vst.msk [vmem:[#allocation2 + $0x169] sm:$0xff] %vm144_vm0, %v228_v29  ;;  %262 = vst.msk [vmem:[#allocation2 + $0x171] sm:$0xff] %vm144_vm0, %v229_v30  ;;  %v561_v0 = vrot.slane %v462_v54, 1  ;;  %v705_v1 = vrot.slane %v461_v53, 2  ;;  %v557_v3 = vsel %vm554_vm2, %v555_v57, %v556_v58  ;;  %v706_v5 = vrot.slane %v462_v54, 2  ;;  %v417_v27 = vld [vmem:[#allocation2 + $0x68] sm:$0xff] }
  0x30   : > { %263 = vst.msk [vmem:[#allocation2 + $0x181] sm:$0xff] %vm144_vm0, %v230_v31  ;;  %264 = vst.msk [vmem:[#allocation2 + $0x189] sm:$0xff] %vm144_vm0, %v231_v32  ;;  %v702_v4 = vsel %vm699_vm3, %v700_v59, %v701_v60  ;;  %v463_v6 = vadd.f32 %v415_v2, %v366_v55  ;;  %v667_v7 = vadd.f32 %v557_v3, %v458_v46  ;;  %v558_v8 = vrot.slane %v460_v62, 1  ;;  %v273_v20 = vld [vmem:[#allocation2 + $0x40] sm:$0x3] }
  0x31   : > { %v703_v9 = vrot.slane %v460_v62, 2  ;;  %v562_v10 = vsel %vm554_vm2, %v560_v63, %v561_v0  ;;  %v707_v12 = vsel %vm699_vm3, %v705_v1, %v706_v5  ;;  %v464_v19 = vadd.f32 %v416_v15, %v367_v52  ;;  %v321_v21 = vld [vmem:[#allocation2 + $0x58] sm:$0x3]  ;;  %v1212_v22 = vld [vmem:[%s1381_s1] ss:$0 sm:$0xff] }
  0x32   : > { %v669_v11 = vadd.f32 %v562_v10, %v461_v53  ;;  %v563_v13 = vrot.slane %v463_v6, 1  ;;  %v708_v14 = vrot.slane %v463_v6, 2  ;;  %v812_v16 = vadd.f32 %v702_v4, %v667_v7  ;;  %v418_v40 = vld [vmem:[#allocation2 + $0x70] sm:$0x3]  ;;  %v276_v46 = vld [vmem:[#allocation2 + $0x58] sm:$0x3] }
  0x33   : > { %v559_v17 = vsel %vm554_vm2, %v556_v58, %v558_v8  ;;  %v704_v18 = vsel %vm699_vm3, %v701_v60, %v703_v9  ;;  %v465_v30 = vadd.f32 %v417_v27, %v368_v56  ;;  %v565_v31 = vrot.slane %v464_v19, 1  ;;  %v419_v53 = vld [vmem:[#allocation2 + $0x78] sm:$0xff]  ;;  %v420_v57 = vld [vmem:[#allocation2 + $0x80] sm:$0xff]  ;;  %v279_v1 = vld [vmem:[#allocation2 + $0x70] sm:$0x3] }
  0x34   : > { %v668_v23 = vadd.f32 %v559_v17, %v459_v47  ;;  %v814_v24 = vadd.f32 %v707_v12, %v669_v11  ;;  %v564_v25 = vsel %vm554_vm2, %v561_v0, %v563_v13  ;;  %v709_v26 = vsel %vm699_vm3, %v706_v5, %v708_v14  ;;  %v324_v47 = vld [vmem:[#allocation2 + $0x70] sm:$0x3]  ;;  %v327_v2 = vld [vmem:[#allocation2 + $0x88] sm:$0x3] }
  0x35   : > { %v844_v28 = vmul.f32 0.11111111, %v812_v16  ;;  %v670_v29 = vadd.f32 %v564_v25, %v462_v54  ;;  %v710_v34 = vrot.slane %v464_v19, 2  ;;  %v369_v35 = vadd.f32 %v321_v21, %v273_v20  ;;  %v421_v7 = vld [vmem:[#allocation2 + $0x88] sm:$0x3]  ;;  %v422_v12 = vld [vmem:[#allocation2 + $0x90] sm:$0xff] }
  0x36   : > { %v813_v32 = vadd.f32 %v704_v18, %v668_v23  ;;  %v846_v33 = vmul.f32 0.11111111, %v814_v24  ;;  %v566_v38 = vrot.slane %v465_v30, 1  ;;  %v711_v39 = vrot.slane %v465_v30, 2  ;;  %v423_v21 = vld [vmem:[#allocation2 + $0x98] sm:$0xff] }
  0x37   : > { %v883_v36 = vadd.f32 %v1212_v22, %v844_v28  ;;  %v815_v37 = vadd.f32 %v709_v26, %v670_v29  ;;  %v466_v43 = vadd.f32 %v418_v40, %v369_v35  ;;  %v370_v44 = vadd.f32 %v416_v15, %v1195_v45 }
  0x38   : > { %v845_v41 = vmul.f32 0.11111111, %v813_v32  ;;  %v885_v42 = vadd.f32 %v1212_v22, %v846_v33  ;;  %v567_v50 = vsel %vm554_vm2, %v565_v31, %v566_v38  ;;  %v712_v51 = vsel %vm699_vm3, %v710_v34, %v711_v39 }
  0x39   : > { %915 = vst.msk [vmem:[%s1221_s20] sm:$0xff] %vm144_vm0, %v883_v36  ;;  %v847_v48 = vmul.f32 0.11111111, %v815_v37  ;;  %v371_v52 = vadd.f32 %v417_v27, %v1197_v49  ;;  %v671_v55 = vadd.f32 %v567_v50, %v464_v19  ;;  %v568_v45 = vrot.slane %v466_v43, 1 }
  0x3a   : > { %v884_v54 = vadd.f32 %v1212_v22, %v845_v41  ;;  %917 = vst.msk [vmem:[%s1221_s20 + $0x10] sm:$0xff] %vm144_vm0, %v885_v42  ;;  %v713_v56 = vrot.slane %v466_v43, 2  ;;  %v467_v59 = vadd.f32 %v419_v53, %v370_v44  ;;  %v372_v61 = vadd.f32 %v324_v47, %v276_v46  ;;  %v425_v44 = vld [vmem:[#allocation2 + $0xa8] sm:$0xff]  ;;  %v330_v47 = vld [vmem:[#allocation2 + $0xa0] sm:$0x3] }
  0x3b   : > { %v886_v58 = vadd.f32 %v1212_v22, %v847_v48  ;;  %v468_v60 = vadd.f32 %v420_v57, %v371_v52  ;;  %v816_v62 = vadd.f32 %v712_v51, %v671_v55  ;;  %v569_v49 = vsel %vm554_vm2, %v566_v38, %v568_v45  ;;  %v282_v46 = vld [vmem:[#allocation2 + $0x88] sm:$0x3] }
  0x3c   : > { %916 = vst.msk [vmem:[%s1221_s20 + $0x8] sm:$0xff] %vm144_vm0, %v884_v54  ;;  %v714_v63 = vsel %vm699_vm3, %v711_v39, %v713_v56  ;;  %v373_v0 = vadd.f32 %v419_v53, %v416_v15  ;;  %v672_v3 = vadd.f32 %v569_v49, %v465_v30  ;;  %v570_v4 = vrot.slane %v467_v59, 1  ;;  %v426_v56 = vld [vmem:[#allocation2 + $0xb0] sm:$0xff] }
  0x3d   : > { %918 = vst.msk [vmem:[%s1221_s20 + $0x18] sm:$0xff] %vm144_vm0, %v886_v58  ;;  %v571_v5 = vrot.slane %v468_v60, 1  ;;  %v715_v6 = vrot.slane %v467_v59, 2  ;;  %v848_v8 = vmul.f32 0.11111111, %v816_v62  ;;  %v716_v9 = vrot.slane %v468_v60, 2 }
  0x3e   : > { %v469_v10 = vadd.f32 %v421_v7, %v372_v61  ;;  %v374_v11 = vadd.f32 %v420_v57, %v417_v27  ;;  %v817_v13 = vadd.f32 %v714_v63, %v672_v3  ;;  %v470_v16 = vadd.f32 %v422_v12, %v373_v0  ;;  %v424_v27 = vld [vmem:[#allocation2 + $0xa0] sm:$0x3]  ;;  %v333_v62 = vld [vmem:[#allocation2 + $0xb8] sm:$0x3] }
  0x3f   : > { %v572_v14 = vsel %vm554_vm2, %v570_v4, %v571_v5  ;;  %v375_v15 = vadd.f32 %v327_v2, %v279_v1  ;;  %v887_v17 = vadd.f32 %v1212_v22, %v848_v8  ;;  %v717_v19 = vsel %vm699_vm3, %v715_v6, %v716_v9  ;;  %v285_v61 = vld [vmem:[#allocation2 + $0xa0] sm:$0x3]  ;;  %v427_v2 = vld [vmem:[#allocation2 + $0xb8] sm:$0x3] }
  0x40   : > { %v673_v18 = vadd.f32 %v572_v14, %v467_v59  ;;  %v573_v20 = vrot.slane %v469_v10, 1  ;;  %v849_v23 = vmul.f32 0.11111111, %v817_v13  ;;  %v718_v24 = vrot.slane %v469_v10, 2  ;;  %v428_v7 = vld [vmem:[#allocation2 + $0xc0] sm:$0xff] }
  0x41   : > { %v471_v25 = vadd.f32 %v423_v21, %v374_v11  ;;  %v575_v26 = vrot.slane %v470_v16, 1  ;;  %919 = vst.msk [vmem:[%s1221_s20 + $0x20] sm:$0xff] %vm144_vm0, %v887_v17  ;;  %v720_v30 = vrot.slane %v470_v16, 2  ;;  %v472_v31 = vadd.f32 %v424_v27, %v375_v15  ;;  %v429_v15 = vld [vmem:[#allocation2 + $0xc8] sm:$0xff] }
  0x42   : > { %v818_v28 = vadd.f32 %v717_v19, %v673_v18  ;;  %v574_v29 = vsel %vm554_vm2, %v571_v5, %v573_v20  ;;  %v888_v32 = vadd.f32 %v1212_v22, %v849_v23  ;;  %v719_v34 = vsel %vm699_vm3, %v716_v9, %v718_v24  ;;  %v430_v23 = vld [vmem:[#allocation2 + $0xd0] sm:$0x3] }
  0x43   : > { %v674_v33 = vadd.f32 %v574_v29, %v468_v60  ;;  %v576_v35 = vrot.slane %v471_v25, 1  ;;  %v721_v37 = vrot.slane %v471_v25, 2  ;;  %v578_v38 = vrot.slane %v472_v31, 1 }
  0x44   : > { %v850_v36 = vmul.f32 0.11111111, %v818_v28  ;;  %v723_v39 = vrot.slane %v472_v31, 2  ;;  %920 = vst.msk [vmem:[%s1221_s20 + $0x28] sm:$0xff] %vm144_vm0, %v888_v32  ;;  %v376_v42 = vadd.f32 %v422_v12, %v419_v53  ;;  %v377_v43 = vadd.f32 %v423_v21, %v420_v57 }
  0x45   : > { %v819_v40 = vadd.f32 %v719_v34, %v674_v33  ;;  %v577_v41 = vsel %vm554_vm2, %v575_v26, %v576_v35  ;;  %v722_v51 = vsel %vm699_vm3, %v720_v30, %v721_v37  ;;  %v579_v52 = vsel %vm554_vm2, %v576_v35, %v578_v38  ;;  %v431_v35 = vld [vmem:[#allocation2 + $0xd8] sm:$0xff] }
  0x46   : > { %v889_v48 = vadd.f32 %v1212_v22, %v850_v36  ;;  %v675_v50 = vadd.f32 %v577_v41, %v470_v16  ;;  %v676_v55 = vadd.f32 %v579_v52, %v471_v25  ;;  %v724_v45 = vsel %vm699_vm3, %v721_v37, %v723_v39  ;;  %v336_v41 = vld [vmem:[#allocation2 + $0xd0] sm:$0x3] }
  0x47   : > { %v851_v54 = vmul.f32 0.11111111, %v819_v40  ;;  %v473_v58 = vadd.f32 %v425_v44, %v376_v42  ;;  %v474_v57 = vadd.f32 %v426_v56, %v377_v43  ;;  %v378_v59 = vadd.f32 %v330_v47, %v282_v46  ;;  %v288_v40 = vld [vmem:[#allocation2 + $0xb8] sm:$0x3] }
  0x48   : > { %921 = vst.msk [vmem:[%s1221_s20 + $0x30] sm:$0xff] %vm144_vm0, %v889_v48  ;;  %v820_v53 = vadd.f32 %v722_v51, %v675_v50  ;;  %v379_v60 = vadd.f32 %v425_v44, %v422_v12  ;;  %v821_v63 = vadd.f32 %v724_v45, %v676_v55  ;;  %v380_v9 = vadd.f32 %v426_v56, %v423_v21  ;;  %v432_v51 = vld [vmem:[#allocation2 + $0xe0] sm:$0xff] }
  0x49   : > { %v890_v49 = vadd.f32 %v1212_v22, %v851_v54  ;;  %v580_v0 = vrot.slane %v473_v58, 1  ;;  %v725_v1 = vrot.slane %v473_v58, 2  ;;  %v581_v4 = vrot.slane %v474_v57, 1 }
  0x4a   : > { %v852_v3 = vmul.f32 0.11111111, %v820_v53  ;;  %v726_v5 = vrot.slane %v474_v57, 2  ;;  %v475_v6 = vadd.f32 %v427_v2, %v378_v59  ;;  %v853_v8 = vmul.f32 0.11111111, %v821_v63  ;;  %v434_v2 = vld [vmem:[#allocation2 + $0xf0] sm:$0xff] }
  0x4b   : > { %922 = vst.msk [vmem:[%s1221_s20 + $0x38] sm:$0xff] %vm144_vm0, %v890_v49  ;;  %v476_v10 = vadd.f32 %v428_v7, %v379_v60  ;;  %v381_v11 = vadd.f32 %v333_v62, %v285_v61  ;;  %v582_v13 = vsel %vm554_vm2, %v580_v0, %v581_v4  ;;  %v477_v20 = vadd.f32 %v429_v15, %v380_v9  ;;  %v339_v53 = vld [vmem:[#allocation2 + $0xe8] sm:$0x3] }
  0x4c   : > { %v891_v12 = vadd.f32 %v1212_v22, %v852_v3  ;;  %v727_v14 = vsel %vm699_vm3, %v725_v1, %v726_v5  ;;  %v583_v16 = vrot.slane %v475_v6, 1  ;;  %v892_v17 = vadd.f32 %v1212_v22, %v853_v8  ;;  %v433_v62 = vld [vmem:[#allocation2 + $0xe8] sm:$0x3] }
  0x4d   : > { %v677_v18 = vadd.f32 %v582_v13, %v473_v58  ;;  %v728_v19 = vrot.slane %v475_v6, 2  ;;  %v585_v24 = vrot.slane %v476_v10, 1  ;;  %v730_v25 = vrot.slane %v476_v10, 2  ;;  %v291_v58 = vld [vmem:[#allocation2 + $0xd0] sm:$0x3] }
  0x4e   : > { %923 = vst.msk [vmem:[%s1221_s20 + $0x40] sm:$0xff] %vm144_vm0, %v891_v12  ;;  %v584_v21 = vsel %vm554_vm2, %v581_v4, %v583_v16  ;;  %v478_v26 = vadd.f32 %v430_v23, %v381_v11  ;;  %924 = vst.msk [vmem:[%s1221_s20 + $0x48] sm:$0xff] %vm144_vm0, %v892_v17  ;;  %v586_v30 = vrot.slane %v477_v20, 1  ;;  %v731_v31 = vrot.slane %v477_v20, 2  ;;  %v435_v11 = vld [vmem:[#allocation2 + $0xf8] sm:$0xff] }
  0x4f   : > { %v822_v27 = vadd.f32 %v727_v14, %v677_v18  ;;  %v678_v28 = vadd.f32 %v584_v21, %v474_v57  ;;  %v729_v29 = vsel %vm699_vm3, %v726_v5, %v728_v19  ;;  %v382_v34 = vadd.f32 %v428_v7, %v425_v44  ;;  %v436_v17 = vld [vmem:[#allocation2 + $0x100] sm:$0x3] }
  0x50   : > { %v588_v32 = vrot.slane %v478_v26, 1  ;;  %v733_v33 = vrot.slane %v478_v26, 2  ;;  %v587_v38 = vsel %vm554_vm2, %v585_v24, %v586_v30  ;;  %v383_v39 = vadd.f32 %v429_v15, %v426_v56 }
  0x51   : > { %v854_v36 = vmul.f32 0.11111111, %v822_v27  ;;  %v823_v37 = vadd.f32 %v729_v29, %v678_v28  ;;  %v679_v42 = vadd.f32 %v587_v38, %v476_v10  ;;  %v732_v43 = vsel %vm699_vm3, %v730_v25, %v731_v31 }
  0x52   : > { %v589_v46 = vsel %vm554_vm2, %v586_v30, %v588_v32  ;;  %v734_v47 = vsel %vm699_vm3, %v731_v31, %v733_v33  ;;  %v479_v52 = vadd.f32 %v431_v35, %v382_v34  ;;  %v480_v55 = vadd.f32 %v432_v51, %v383_v39  ;;  %v437_v30 = vld [vmem:[#allocation2 + $0x108] sm:$0xff] }
  0x53   : > { %v893_v48 = vadd.f32 %v1212_v22, %v854_v36  ;;  %v855_v50 = vmul.f32 0.11111111, %v823_v37  ;;  %v680_v44 = vadd.f32 %v589_v46, %v477_v20  ;;  %v824_v54 = vadd.f32 %v732_v43, %v679_v42  ;;  %v294_v36 = vld [vmem:[#allocation2 + $0xe8] sm:$0x3]  ;;  %v342_v37 = vld [vmem:[#allocation2 + $0x100] sm:$0x3] }
  0x54   : > { %v384_v45 = vadd.f32 %v336_v41, %v288_v40  ;;  %v385_v56 = vadd.f32 %v431_v35, %v428_v7  ;;  %v590_v60 = vrot.slane %v479_v52, 1  ;;  %v735_v61 = vrot.slane %v479_v52, 2  ;;  %v438_v46 = vld [vmem:[#allocation2 + $0x110] sm:$0xff] }
  0x55   : > { %925 = vst.msk [vmem:[%s1221_s20 + $0x50] sm:$0xff] %vm144_vm0, %v893_v48  ;;  %v894_v57 = vadd.f32 %v1212_v22, %v855_v50  ;;  %v825_v59 = vadd.f32 %v734_v47, %v680_v44  ;;  %v856_v49 = vmul.f32 0.11111111, %v824_v54  ;;  %v591_v63 = vrot.slane %v480_v55, 1  ;;  %v345_v54 = vld [vmem:[#allocation2 + $0x118] sm:$0x3] }
  0x56   : > { %v736_v0 = vrot.slane %v480_v55, 2  ;;  %v481_v1 = vadd.f32 %v433_v62, %v384_v45  ;;  %v386_v4 = vadd.f32 %v432_v51, %v429_v15  ;;  %v482_v5 = vadd.f32 %v434_v2, %v385_v56  ;;  %v440_v62 = vld [vmem:[#allocation2 + $0x120] sm:$0xff] }
  0x57   : > { %926 = vst.msk [vmem:[%s1221_s20 + $0x58] sm:$0xff] %vm144_vm0, %v894_v57  ;;  %v857_v3 = vmul.f32 0.11111111, %v825_v59  ;;  %v387_v6 = vadd.f32 %v339_v53, %v291_v58  ;;  %v895_v7 = vadd.f32 %v1212_v22, %v856_v49  ;;  %v592_v8 = vsel %vm554_vm2, %v590_v60, %v591_v63  ;;  %v439_v53 = vld [vmem:[#allocation2 + $0x118] sm:$0x3] }
  0x58   : > { %v737_v9 = vsel %vm699_vm3, %v735_v61, %v736_v0  ;;  %v593_v10 = vrot.slane %v481_v1, 1  ;;  %v681_v13 = vadd.f32 %v592_v8, %v479_v52  ;;  %v738_v14 = vrot.slane %v481_v1, 2  ;;  %v297_v52 = vld [vmem:[#allocation2 + $0x100] sm:$0x3] }
  0x59   : > { %v896_v12 = vadd.f32 %v1212_v22, %v857_v3  ;;  %v483_v16 = vadd.f32 %v435_v11, %v386_v4  ;;  %927 = vst.msk [vmem:[%s1221_s20 + $0x60] sm:$0xff] %vm144_vm0, %v895_v7  ;;  %v595_v18 = vrot.slane %v482_v5, 1  ;;  %v740_v19 = vrot.slane %v482_v5, 2 }
  0x5a   : > { %v594_v15 = vsel %vm554_vm2, %v591_v63, %v593_v10  ;;  %v484_v20 = vadd.f32 %v436_v17, %v387_v6  ;;  %v826_v23 = vadd.f32 %v737_v9, %v681_v13  ;;  %v739_v24 = vsel %vm699_vm3, %v736_v0, %v738_v14  ;;  %v441_v6 = vld [vmem:[#allocation2 + $0x128] sm:$0xff] }
  0x5b   : > { %928 = vst.msk [vmem:[%s1221_s20 + $0x68] sm:$0xff] %vm144_vm0, %v896_v12  ;;  %v682_v21 = vadd.f32 %v594_v15, %v480_v55  ;;  %v596_v25 = vrot.slane %v483_v16, 1  ;;  %v741_v26 = vrot.slane %v483_v16, 2  ;;  %v388_v29 = vadd.f32 %v434_v2, %v431_v35  ;;  %v442_v12 = vld [vmem:[#allocation2 + $0x130] sm:$0x3] }
  0x5c   : > { %v598_v27 = vrot.slane %v484_v20, 1  ;;  %v743_v28 = vrot.slane %v484_v20, 2  ;;  %v858_v31 = vmul.f32 0.11111111, %v826_v23  ;;  %v389_v34 = vadd.f32 %v435_v11, %v432_v51 }
  0x5d   : > { %v827_v32 = vadd.f32 %v739_v24, %v682_v21  ;;  %v597_v33 = vsel %vm554_vm2, %v595_v18, %v596_v25  ;;  %v742_v39 = vsel %vm699_vm3, %v740_v19, %v741_v26  ;;  %v485_v47 = vadd.f32 %v437_v30, %v388_v29 }
  0x5e   : > { %v683_v38 = vadd.f32 %v597_v33, %v482_v5  ;;  %v599_v40 = vsel %vm554_vm2, %v596_v25, %v598_v27  ;;  %v744_v41 = vsel %vm699_vm3, %v741_v26, %v743_v28  ;;  %v897_v42 = vadd.f32 %v1212_v22, %v858_v31  ;;  %v443_v25 = vld [vmem:[#allocation2 + $0x138] sm:$0xff] }
  0x5f   : > { %v859_v43 = vmul.f32 0.11111111, %v827_v32  ;;  %v684_v35 = vadd.f32 %v599_v40, %v483_v16  ;;  %v486_v50 = vadd.f32 %v438_v46, %v389_v34  ;;  %v390_v44 = vadd.f32 %v342_v37, %v294_v36  ;;  %v300_v31 = vld [vmem:[#allocation2 + $0x118] sm:$0x3]  ;;  %v348_v32 = vld [vmem:[#allocation2 + $0x130] sm:$0x3] }
  0x60   : > { %v828_v48 = vadd.f32 %v742_v39, %v683_v38  ;;  %v391_v51 = vadd.f32 %v437_v30, %v434_v2  ;;  %929 = vst.msk [vmem:[%s1221_s20 + $0x70] sm:$0xff] %vm144_vm0, %v897_v42  ;;  %v600_v56 = vrot.slane %v485_v47, 1  ;;  %v745_v58 = vrot.slane %v485_v47, 2  ;;  %v444_v40 = vld [vmem:[#allocation2 + $0x140] sm:$0xff] }
  0x61   : > { %v898_v55 = vadd.f32 %v1212_v22, %v859_v43  ;;  %v829_v45 = vadd.f32 %v744_v41, %v684_v35  ;;  %v601_v59 = vrot.slane %v486_v50, 1  ;;  %v746_v60 = vrot.slane %v486_v50, 2 }
  0x62   : > { %v860_v57 = vmul.f32 0.11111111, %v828_v48  ;;  %v487_v61 = vadd.f32 %v439_v53, %v390_v44  ;;  %v392_v63 = vadd.f32 %v438_v46, %v435_v11  ;;  %v488_v0 = vadd.f32 %v440_v62, %v391_v51  ;;  %v351_v48 = vld [vmem:[#allocation2 + $0x148] sm:$0x3]  ;;  %v446_v53 = vld [vmem:[#allocation2 + $0x150] sm:$0xff] }
  0x63   : > { %930 = vst.msk [vmem:[%s1221_s20 + $0x78] sm:$0xff] %vm144_vm0, %v898_v55  ;;  %v861_v49 = vmul.f32 0.11111111, %v829_v45  ;;  %v393_v1 = vadd.f32 %v345_v54, %v297_v52  ;;  %v602_v3 = vsel %vm554_vm2, %v600_v56, %v601_v59  ;;  %v747_v4 = vsel %vm699_vm3, %v745_v58, %v746_v60  ;;  %v445_v54 = vld [vmem:[#allocation2 + $0x148] sm:$0x3] }
  0x64   : > { %v899_v2 = vadd.f32 %v1212_v22, %v860_v57  ;;  %v603_v5 = vrot.slane %v487_v61, 1  ;;  %v685_v8 = vadd.f32 %v602_v3, %v485_v47  ;;  %v748_v9 = vrot.slane %v487_v61, 2  ;;  %v303_v47 = vld [vmem:[#allocation2 + $0x130] sm:$0x3] }
  0x65   : > { %v900_v7 = vadd.f32 %v1212_v22, %v861_v49  ;;  %v489_v10 = vadd.f32 %v441_v6, %v392_v63  ;;  %v605_v13 = vrot.slane %v488_v0, 1  ;;  %v750_v14 = vrot.slane %v488_v0, 2 }
  0x66   : > { %931 = vst.msk [vmem:[%s1221_s20 + $0x80] sm:$0xff] %vm144_vm0, %v899_v2  ;;  %v604_v11 = vsel %vm554_vm2, %v601_v59, %v603_v5  ;;  %v490_v16 = vadd.f32 %v442_v12, %v393_v1  ;;  %v830_v17 = vadd.f32 %v747_v4, %v685_v8  ;;  %v749_v18 = vsel %vm699_vm3, %v746_v60, %v748_v9  ;;  %v447_v1 = vld [vmem:[#allocation2 + $0x158] sm:$0xff] }
  0x67   : > { %932 = vst.msk [vmem:[%s1221_s20 + $0x88] sm:$0xff] %vm144_vm0, %v900_v7  ;;  %v686_v15 = vadd.f32 %v604_v11, %v486_v50  ;;  %v606_v19 = vrot.slane %v489_v10, 1  ;;  %v751_v20 = vrot.slane %v489_v10, 2  ;;  %v394_v24 = vadd.f32 %v440_v62, %v437_v30  ;;  %v448_v7 = vld [vmem:[#allocation2 + $0x160] sm:$0x3] }
  0x68   : > { %v608_v23 = vrot.slane %v490_v16, 1  ;;  %v753_v21 = vrot.slane %v490_v16, 2  ;;  %v862_v26 = vmul.f32 0.11111111, %v830_v17  ;;  %v395_v29 = vadd.f32 %v441_v6, %v438_v46 }
  0x69   : > { %v831_v27 = vadd.f32 %v749_v18, %v686_v15  ;;  %v607_v28 = vsel %vm554_vm2, %v605_v13, %v606_v19  ;;  %v752_v34 = vsel %vm699_vm3, %v750_v14, %v751_v20  ;;  %v491_v41 = vadd.f32 %v443_v25, %v394_v24 }
  0x6a   : > { %v687_v33 = vadd.f32 %v607_v28, %v488_v0  ;;  %v609_v36 = vsel %vm554_vm2, %v606_v19, %v608_v23  ;;  %v754_v37 = vsel %vm699_vm3, %v751_v20, %v753_v21  ;;  %v901_v38 = vadd.f32 %v1212_v22, %v862_v26  ;;  %v449_v19 = vld [vmem:[#allocation2 + $0x168] sm:$0xff] }
  0x6b   : > { %v863_v39 = vmul.f32 0.11111111, %v831_v27  ;;  %v688_v30 = vadd.f32 %v609_v36, %v489_v10  ;;  %v492_v43 = vadd.f32 %v444_v40, %v395_v29  ;;  %v396_v35 = vadd.f32 %v348_v32, %v300_v31  ;;  %v306_v26 = vld [vmem:[#allocation2 + $0x148] sm:$0x3]  ;;  %v354_v27 = vld [vmem:[#allocation2 + $0x160] sm:$0x3] }
  0x6c   : > { %v832_v42 = vadd.f32 %v752_v34, %v687_v33  ;;  %v397_v46 = vadd.f32 %v443_v25, %v440_v62  ;;  %933 = vst.msk [vmem:[%s1221_s20 + $0x90] sm:$0xff] %vm144_vm0, %v901_v38  ;;  %v610_v51 = vrot.slane %v491_v41, 1  ;;  %v755_v52 = vrot.slane %v491_v41, 2  ;;  %v450_v36 = vld [vmem:[#allocation2 + $0x170] sm:$0xff] }
  0x6d   : > { %v902_v50 = vadd.f32 %v1212_v22, %v863_v39  ;;  %v833_v44 = vadd.f32 %v754_v37, %v688_v30  ;;  %v611_v45 = vrot.slane %v492_v43, 1  ;;  %v756_v56 = vrot.slane %v492_v43, 2 }
  0x6e   : > { %v864_v55 = vmul.f32 0.11111111, %v832_v42  ;;  %v493_v58 = vadd.f32 %v445_v54, %v396_v35  ;;  %v398_v59 = vadd.f32 %v444_v40, %v441_v6  ;;  %v494_v60 = vadd.f32 %v446_v53, %v397_v46  ;;  %v357_v42 = vld [vmem:[#allocation2 + $0x178] sm:$0x3]  ;;  %v452_v54 = vld [vmem:[#allocation2 + $0x180] sm:$0xff] }
  0x6f   : > { %934 = vst.msk [vmem:[%s1221_s20 + $0x98] sm:$0xff] %vm144_vm0, %v902_v50  ;;  %v865_v57 = vmul.f32 0.11111111, %v833_v44  ;;  %v399_v61 = vadd.f32 %v351_v48, %v303_v47  ;;  %v612_v49 = vsel %vm554_vm2, %v610_v51, %v611_v45  ;;  %v757_v63 = vsel %vm699_vm3, %v755_v52, %v756_v56  ;;  %v451_v48 = vld [vmem:[#allocation2 + $0x178] sm:$0x3] }
  0x70   : > { %v903_v62 = vadd.f32 %v1212_v22, %v864_v55  ;;  %v613_v0 = vrot.slane %v493_v58, 1  ;;  %v689_v3 = vadd.f32 %v612_v49, %v491_v41  ;;  %v758_v4 = vrot.slane %v493_v58, 2  ;;  %v309_v41 = vld [vmem:[#allocation2 + $0x160] sm:$0x3] }
  0x71   : > { %v904_v2 = vadd.f32 %v1212_v22, %v865_v57  ;;  %v495_v5 = vadd.f32 %v447_v1, %v398_v59  ;;  %v615_v8 = vrot.slane %v494_v60, 1  ;;  %v760_v9 = vrot.slane %v494_v60, 2 }
  0x72   : > { %935 = vst.msk [vmem:[%s1221_s20 + $0xa0] sm:$0xff] %vm144_vm0, %v903_v62  ;;  %v614_v6 = vsel %vm554_vm2, %v611_v45, %v613_v0  ;;  %v496_v10 = vadd.f32 %v448_v7, %v399_v61  ;;  %v834_v12 = vadd.f32 %v757_v63, %v689_v3  ;;  %v759_v13 = vsel %vm699_vm3, %v756_v56, %v758_v4  ;;  %v453_v61 = vld [vmem:[#allocation2 + $0x188] sm:$0xff] }
  0x73   : > { %936 = vst.msk [vmem:[%s1221_s20 + $0xa8] sm:$0xff] %vm144_vm0, %v904_v2  ;;  %v690_v11 = vadd.f32 %v614_v6, %v492_v43  ;;  %v616_v14 = vrot.slane %v495_v5, 1  ;;  %v761_v16 = vrot.slane %v495_v5, 2  ;;  %v400_v18 = vadd.f32 %v446_v53, %v443_v25  ;;  %v454_v2 = vld [vmem:[#allocation2 + $0x190] sm:$0x3] }
  0x74   : > { %v618_v17 = vrot.slane %v496_v10, 1  ;;  %v763_v15 = vrot.slane %v496_v10, 2  ;;  %v866_v20 = vmul.f32 0.11111111, %v834_v12  ;;  %v401_v24 = vadd.f32 %v447_v1, %v444_v40 }
  0x75   : > { %v835_v23 = vadd.f32 %v759_v13, %v690_v11  ;;  %v617_v21 = vsel %vm554_vm2, %v615_v8, %v616_v14  ;;  %v762_v29 = vsel %vm699_vm3, %v760_v9, %v761_v16  ;;  %v497_v37 = vadd.f32 %v449_v19, %v400_v18 }
  0x76   : > { %v691_v28 = vadd.f32 %v617_v21, %v494_v60  ;;  %v619_v31 = vsel %vm554_vm2, %v616_v14, %v618_v17  ;;  %v764_v32 = vsel %vm699_vm3, %v761_v16, %v763_v15  ;;  %v905_v33 = vadd.f32 %v1212_v22, %v866_v20  ;;  %v455_v14 = vld [vmem:[#allocation2 + $0x198] sm:$0xff]  ;;  %v456_v16 = vld [vmem:[#allocation2 + $0x1a0] sm:$0xff]  ;;  %v360_v21 = vld [vmem:[#allocation2 + $0x190] sm:$0x3] }
  0x77   : > { %v867_v34 = vmul.f32 0.11111111, %v835_v23  ;;  %v692_v25 = vadd.f32 %v619_v31, %v495_v5  ;;  %v498_v39 = vadd.f32 %v450_v36, %v401_v24  ;;  %v402_v30 = vadd.f32 %v354_v27, %v306_v26  ;;  %v312_v23 = vld [vmem:[#allocation2 + $0x178] sm:$0x3] }
  0x78   : > { %v836_v38 = vadd.f32 %v762_v29, %v691_v28  ;;  %v403_v40 = vadd.f32 %v449_v19, %v446_v53  ;;  %937 = vst.msk [vmem:[%s1221_s20 + $0xb0] sm:$0xff] %vm144_vm0, %v905_v33  ;;  %v620_v46 = vrot.slane %v497_v37, 1  ;;  %v765_v47 = vrot.slane %v497_v37, 2 }
  0x79   : > { %v906_v43 = vadd.f32 %v1212_v22, %v867_v34  ;;  %v837_v35 = vadd.f32 %v764_v32, %v692_v25  ;;  %v621_v44 = vrot.slane %v498_v39, 1  ;;  %v766_v51 = vrot.slane %v498_v39, 2  ;;  %v457_v32 = vld [vmem:[#allocation2 + $0x1a8] sm:$0x3] }
  0x7a   : > { %v868_v50 = vmul.f32 0.11111111, %v836_v38  ;;  %v499_v52 = vadd.f32 %v451_v48, %v402_v30  ;;  %v404_v45 = vadd.f32 %v450_v36, %v447_v1  ;;  %v500_v56 = vadd.f32 %v452_v54, %v403_v40 }
  0x7b   : > { %938 = vst.msk [vmem:[%s1221_s20 + $0xb8] sm:$0xff] %vm144_vm0, %v906_v43  ;;  %v869_v55 = vmul.f32 0.11111111, %v837_v35  ;;  %v405_v58 = vadd.f32 %v357_v42, %v309_v41  ;;  %v622_v57 = vsel %vm554_vm2, %v620_v46, %v621_v44  ;;  %v767_v59 = vsel %vm699_vm3, %v765_v47, %v766_v51 }
  0x7c   : > { %v907_v53 = vadd.f32 %v1212_v22, %v868_v50  ;;  %v623_v60 = vrot.slane %v499_v52, 1  ;;  %v693_v49 = vadd.f32 %v622_v57, %v497_v37  ;;  %v768_v63 = vrot.slane %v499_v52, 2 }
  0x7d   : > { %v908_v62 = vadd.f32 %v1212_v22, %v869_v55  ;;  %v501_v0 = vadd.f32 %v453_v61, %v404_v45  ;;  %v625_v3 = vrot.slane %v500_v56, 1  ;;  %v770_v4 = vrot.slane %v500_v56, 2 }
  0x7e   : > { %939 = vst.msk [vmem:[%s1221_s20 + $0xc0] sm:$0xff] %vm144_vm0, %v907_v53  ;;  %v624_v1 = vsel %vm554_vm2, %v621_v44, %v623_v60  ;;  %v502_v5 = vadd.f32 %v454_v2, %v405_v58  ;;  %v838_v7 = vadd.f32 %v767_v59, %v693_v49  ;;  %v769_v8 = vsel %vm699_vm3, %v766_v51, %v768_v63 }
  0x7f   : > { %940 = vst.msk [vmem:[%s1221_s20 + $0xc8] sm:$0xff] %vm144_vm0, %v908_v62  ;;  %v694_v6 = vadd.f32 %v624_v1, %v498_v39  ;;  %v626_v9 = vrot.slane %v501_v0, 1  ;;  %v771_v10 = vrot.slane %v501_v0, 2  ;;  %v406_v13 = vadd.f32 %v452_v54, %v449_v19 }
  0x80   : > { %v628_v12 = vrot.slane %v502_v5, 1  ;;  %v773_v11 = vrot.slane %v502_v5, 2  ;;  %v870_v17 = vmul.f32 0.11111111, %v838_v7  ;;  %v407_v20 = vadd.f32 %v453_v61, %v450_v36 }
  0x81   : > { %v839_v15 = vadd.f32 %v769_v8, %v694_v6  ;;  %v627_v18 = vsel %vm554_vm2, %v625_v3, %v626_v9  ;;  %v772_v26 = vsel %vm699_vm3, %v770_v4, %v771_v10  ;;  %v503_v19 = vadd.f32 %v455_v14, %v406_v13 }
  0x82   : > { %v695_v24 = vadd.f32 %v627_v18, %v500_v56  ;;  %v629_v27 = vsel %vm554_vm2, %v626_v9, %v628_v12  ;;  %v909_v28 = vadd.f32 %v1212_v22, %v870_v17  ;;  %v774_v34 = vsel %vm699_vm3, %v771_v10, %v773_v11 }
  0x83   : > { %v871_v29 = vmul.f32 0.11111111, %v839_v15  ;;  %v696_v31 = vadd.f32 %v629_v27, %v501_v0  ;;  %v504_v25 = vadd.f32 %v456_v16, %v407_v20  ;;  %v408_v37 = vadd.f32 %v360_v21, %v312_v23 }
  0x84   : > { %v840_v33 = vadd.f32 %v772_v26, %v695_v24  ;;  %941 = vst.msk [vmem:[%s1221_s20 + $0xd0] sm:$0xff] %vm144_vm0, %v909_v28  ;;  %v630_v39 = vrot.slane %v503_v19, 1  ;;  %v775_v30 = vrot.slane %v503_v19, 2 }
  0x85   : > { %v910_v36 = vadd.f32 %v1212_v22, %v871_v29  ;;  %v841_v38 = vadd.f32 %v774_v34, %v696_v31  ;;  %v631_v41 = vrot.slane %v504_v25, 1  ;;  %v776_v42 = vrot.slane %v504_v25, 2 }
  0x86   : > { %v872_v40 = vmul.f32 0.11111111, %v840_v33  ;;  %v505_v43 = vadd.f32 %v457_v32, %v408_v37 }
  0x87   : > { %942 = vst.msk [vmem:[%s1221_s20 + $0xd8] sm:$0xff] %vm144_vm0, %v910_v36  ;;  %v873_v35 = vmul.f32 0.11111111, %v841_v38  ;;  %v632_v47 = vsel %vm554_vm2, %v630_v39, %v631_v41  ;;  %v777_v52 = vsel %vm699_vm3, %v775_v30, %v776_v42 }
  0x88   : > { %v911_v46 = vadd.f32 %v1212_v22, %v872_v40  ;;  %v633_v48 = vrot.slane %v505_v43, 1  ;;  %v697_v44 = vadd.f32 %v632_v47, %v503_v19  ;;  %v778_v51 = vrot.slane %v505_v43, 2 }
  0x89   : > { %v912_v50 = vadd.f32 %v1212_v22, %v873_v35 }
  0x8a   : > { %943 = vst.msk [vmem:[%s1221_s20 + $0xe0] sm:$0xff] %vm144_vm0, %v911_v46  ;;  %v634_v54 = vsel %vm554_vm2, %v631_v41, %v633_v48  ;;  %v842_v55 = vadd.f32 %v777_v52, %v697_v44  ;;  %v779_v56 = vsel %vm699_vm3, %v776_v42, %v778_v51 }
  0x8b   : > { %944 = vst.msk [vmem:[%s1221_s20 + $0xe8] sm:$0xff] %vm144_vm0, %v912_v50  ;;  %v698_v45 = vadd.f32 %v634_v54, %v504_v25 }
  0x8c   : > { %v874_v58 = vmul.f32 0.11111111, %v842_v55 }
  0x8d   : > { %v843_v53 = vadd.f32 %v779_v56, %v698_v45 }
  0x8e   : > { %v913_v57 = vadd.f32 %v1212_v22, %v874_v58 }
  0x8f   : > { %v875_v59 = vmul.f32 0.11111111, %v843_v53 }
  0x90   : > { %945 = vst.msk [vmem:[%s1221_s20 + $0xf0] sm:$0xff] %vm144_vm0, %v913_v57 }
  0x91   : > { %v914_v60 = vadd.f32 %v1212_v22, %v875_v59 }
  0x93   : > { %946 = vst.msk [vmem:[%s1221_s20 + $0xf8] sm:$0xff] %vm144_vm0, %v914_v60 }
  0x94 PF: > { %s12_s9 = sadd.s32 1, %s1031_s9  }
  0x95   : > { %p9_p4 = scmp.ge.s32.totalorder %s12_s9, 4  }
  0x97   :  { %11 = sbr.rel (!%p9_p4) target bundleno = 1 (0x1), region = 60 }

</bundles_post_ra>
